<compile_context>
chip_gen: v6e
topology: v6e:2x2x1
jax: 0.10.0
libtpu: 0.0.40
codegen_flags: <defaults>
</compile_context>

<pallas_src>
import math

import jax
import jax.numpy as jnp
from jax.experimental import pallas as pl
from jax.experimental.pallas import tpu as pltpu


# ---------------------------------------------------------------------------
# Fused kernel:
#   grid = (row tiles i, contraction tiles k), k innermost ("arbitrary").
#   Per (i, k): recompute support K-slab = X[k] @ W, accumulate A[i,k] @ slab
#   into per-relation f32 accumulators; on the last k, add bias, compute the
#   softmax attention over relations and write the weighted sum + weights.
# ---------------------------------------------------------------------------
def _mwgcn_kernel(adj_ref, x_ref, w_ref, bias_ref, attw_ref, attb_ref,
                  out_ref, attn_ref, acc_ref):
    # adj_ref:  [R, TM, TK] bf16     x_ref:   [R, TK, Din] bf16
    # w_ref:    [R, Din, Dp] bf16    bias_ref:[R, Dp] f32
    # attw_ref: [1, Dp] f32          attb_ref:[1, 1] f32 (SMEM)
    # out_ref:  [TM, Dp] f32         attn_ref:[R, TM] f32 (lane-dense)
    # acc_ref:  [R, TM, Dp] f32 scratch (per-relation accumulators)
    k = pl.program_id(1)
    nk = pl.num_programs(1)
    r_count = adj_ref.shape[0]

    @pl.when(k == 0)
    def _init():
        acc_ref[...] = jnp.zeros_like(acc_ref)

    # MXU: support slab for this K-tile, then accumulate A_r @ support_r.
    # R is small & static -> Python loop unrolls at trace time.
    for r in range(r_count):
        sup = jnp.dot(
            x_ref[r], w_ref[r], preferred_element_type=jnp.float32
        ).astype(jnp.bfloat16)                                    # [TK, Dp]
        acc_ref[r] += jnp.dot(
            adj_ref[r], sup, preferred_element_type=jnp.float32)  # [TM, Dp]

    @pl.when(k == nk - 1)
    def _finalize():
        outs = acc_ref[...] + bias_ref[...][:, None, :]           # [R, TM, Dp]
        attw = attw_ref[...][None, :, :]                          # [1, 1, Dp]
        attb = attb_ref[0, 0]
        # Fused per-relation score epilogue (att_activate = None).
        scores = jnp.sum(outs * attw, axis=-1, keepdims=True) + attb  # [R,TM,1]
        m = jnp.max(scores, axis=0, keepdims=True)
        e = jnp.exp(scores - m)
        w = e * pl.reciprocal(jnp.sum(e, axis=0, keepdims=True), approx=True)
        out_ref[...] = jnp.sum(outs * w, axis=0)                  # [TM, Dp]
        attn_ref[...] = jnp.squeeze(w, axis=-1)                   # [R, TM]


def mwgcn_forward(adj, x, weights, biases, att_weight, att_bias,
                  *, tm=128, tk=128):
    """Fused mwGCN forward.

    adj: [R,N,N] dense adjacency, x: [R,N,Din], weights: [R,Din,Dout],
    biases: [R,Dout], att_weight: [Dout,1], att_bias: [1].
    Returns (real_output [N,Dout] f32, attention weights [N,R,1] f32).

    tm/tk: row / contraction tile sizes.  128 is fine for small graphs; for
    large N raise to 512 on v5e/v6e (128 MiB VMEM) and 256-512 on v7x (64 MiB).
    """
    assert tm == tk, "single padded N used for both row and K tiling"
    r_count, n, d_in = x.shape
    d_out = weights.shape[-1]
    f32 = jnp.float32

    # Lane padding: Dout -> multiple of 128 (dense MXU output + unmasked vst).
    d_pad = max(128, ((d_out + 127) // 128) * 128)
    # Row / contraction padding: N -> multiple of tile size (zero pads).
    n_pad = ((n + tm - 1) // tm) * tm

    w_p = jnp.zeros((r_count, d_in, d_pad), f32).at[:, :, :d_out].set(weights)
    b_p = jnp.zeros((r_count, d_pad), f32).at[:, :d_out].set(biases)
    attw_p = jnp.zeros((1, d_pad), f32).at[0, :d_out].set(att_weight[:, 0])
    attb = jnp.asarray(att_bias, f32).reshape(1, 1)

    x_p = jnp.zeros((r_count, n_pad, d_in), f32).at[:, :n, :].set(x)
    adj_p = jnp.zeros((r_count, n_pad, n_pad), f32).at[:, :n, :n].set(adj)

    # bf16 MXU inputs (f32 accumulation inside the kernel).
    x_bf = x_p.astype(jnp.bfloat16)
    w_bf = w_p.astype(jnp.bfloat16)
    adj_bf = adj_p.astype(jnp.bfloat16)

    # Explicit scoped-VMEM budget: plenty for big tiles, still < v7x's 64 MiB.
    vmem_limit = 48 * 1024 * 1024

    out_p, attn_p = pl.pallas_call(
        _mwgcn_kernel,
        out_shape=(jax.ShapeDtypeStruct((n_pad, d_pad), f32),
                   jax.ShapeDtypeStruct((r_count, n_pad), f32)),
        grid_spec=pltpu.PrefetchScalarGridSpec(
            num_scalar_prefetch=0,
            grid=(n_pad // tm, n_pad // tk),
            in_specs=[
                # adjacency slab for (row tile i, K tile k)
                pl.BlockSpec((r_count, tm, tk), lambda i, k: (0, i, k)),
                # X rows of the K slab (support recomputed on the fly)
                pl.BlockSpec((r_count, tk, d_in), lambda i, k: (0, k, 0)),
                # resident small operands (constant index maps)
                pl.BlockSpec((r_count, d_in, d_pad), lambda i, k: (0, 0, 0)),
                pl.BlockSpec((r_count, d_pad), lambda i, k: (0, 0)),
                pl.BlockSpec((1, d_pad), lambda i, k: (0, 0)),
                pl.BlockSpec(memory_space=pltpu.MemorySpace.SMEM),
            ],
            out_specs=(pl.BlockSpec((tm, d_pad), lambda i, k: (i, 0)),
                       pl.BlockSpec((r_count, tm), lambda i, k: (0, i))),
            scratch_shapes=[pltpu.VMEM((r_count, tm, d_pad), f32)],
        ),
        compiler_params=pltpu.CompilerParams(
            dimension_semantics=("parallel", "arbitrary"),
            vmem_limit_bytes=vmem_limit),
    )(adj_bf, x_bf, w_bf, b_p, attw_p, attb)

    real = out_p[:n, :d_out]
    # Kernel stores lane-dense [R, N]; tiny host transpose to the [N, R, 1]
    # convention (R*N*4 bytes, negligible).
    attn = attn_p[:, :n].T[:, :, None]
    return real, attn


# ---------------------------------------------------------------------------
# References
# ---------------------------------------------------------------------------
def _reference_f32(adj, x, weights, biases, att_weight, att_bias):
    outs = jnp.stack([adj[r] @ (x[r] @ weights[r]) + biases[r][None, :]
                      for r in range(adj.shape[0])], axis=0)
    scores = outs @ att_weight + att_bias
    w = jax.nn.softmax(scores, axis=0)
    return jnp.sum(outs * w, axis=0), jnp.transpose(w, (1, 0, 2))


def _reference_bf16(adj, x, weights, biases, att_weight, att_bias):
    # Mirrors the kernel's precision: bf16 operands, f32 accumulation,
    # bf16-rounded intermediate support; exact softmax.
    f32 = jnp.float32
    adj_b = adj.astype(jnp.bfloat16)
    x_b = x.astype(jnp.bfloat16)
    w_b = weights.astype(jnp.bfloat16)
    outs = []
    for r in range(adj.shape[0]):
        sup = jnp.dot(x_b[r], w_b[r],
                      preferred_element_type=f32).astype(jnp.bfloat16)
        outs.append(jnp.dot(adj_b[r], sup, preferred_element_type=f32)
                    + biases[r][None, :])
    outs = jnp.stack(outs, axis=0)
    scores = outs @ att_weight + att_bias
    w = jax.nn.softmax(scores, axis=0)
    return jnp.sum(outs * w, axis=0), jnp.transpose(w, (1, 0, 2))


def _kaiming_uniform(key, shape):
    # torch.nn.init.kaiming_uniform_ defaults: a=0, fan_in mode, gain=sqrt(2)
    fan_in = shape[1]
    bound = math.sqrt(2.0) * math.sqrt(3.0 / fan_in)
    return jax.random.uniform(key, shape, jnp.float32, -bound, bound)


if __name__ == "__main__":
    rel_num, n_nodes, input_dim, output_dim = 2, 256, 32, 32

    key = jax.random.PRNGKey(0)
    k_x, k_a, k_w, k_b, k_aw = jax.random.split(key, 5)

    # Input node features per relation.
    x = jax.random.normal(k_x, (rel_num, n_nodes, input_dim), jnp.float32)

    # Dense row-normalized adjacency per relation (stands in for the sparse
    # adjacency of torch.sparse.mm).
    a_raw = jax.random.uniform(k_a, (rel_num, n_nodes, n_nodes), jnp.float32)
    a_raw = (a_raw > 0.9).astype(jnp.float32) + jnp.eye(n_nodes)[None]
    adj = a_raw / jnp.sum(a_raw, axis=-1, keepdims=True)

    # Parameters (kaiming-uniform weights; small nonzero biases to exercise
    # the use_bias / att_bias code paths).
    wkeys = jax.random.split(k_w, rel_num)
    weights = jnp.stack([_kaiming_uniform(wkeys[r], (input_dim, output_dim))
                         for r in range(rel_num)])
    biases = 0.1 * jax.random.normal(k_b, (rel_num, output_dim), jnp.float32)
    att_weight = _kaiming_uniform(k_aw, (output_dim, 1))
    att_bias = jnp.array([0.05], jnp.float32)

    out, att_w = mwgcn_forward(adj, x, weights, biases, att_weight, att_bias)
    out = jax.block_until_ready(out)
    att_w = jax.block_until_ready(att_w)

    assert out.shape == (n_nodes, output_dim)
    assert att_w.shape == (n_nodes, rel_num, 1)

    # Tight check against a precision-matched (bf16-operand) reference.
    ref_out_b, ref_w_b = _reference_bf16(adj, x, weights, biases,
                                         att_weight, att_bias)
    assert jnp.allclose(out, ref_out_b, rtol=5e-3, atol=5e-3)
    assert jnp.allclose(att_w, ref_w_b, rtol=5e-3, atol=5e-3)

    # Coarse check against the full-f32 reference (bf16 quantization slack).
    ref_out_f, ref_w_f = _reference_f32(adj, x, weights, biases,
                                        att_weight, att_bias)
    assert jnp.allclose(out, ref_out_f, rtol=5e-2, atol=5e-2)
    assert jnp.allclose(att_w, ref_w_f, rtol=5e-2, atol=5e-2)

    print("KERNEL_OK")
</pallas_src>

<mosaic_0001>
module attributes {stable_mosaic.version = 11 : i64} {
  func.func @_mwgcn_kernel(%arg0: i32, %arg1: i32, %arg2: memref<2x128x128xbf16, #tpu.memory_space<vmem>>, %arg3: memref<2x128x32xbf16, #tpu.memory_space<vmem>>, %arg4: memref<2x32x128xbf16, #tpu.memory_space<vmem>>, %arg5: memref<2x128xf32, #tpu.memory_space<vmem>>, %arg6: memref<1x128xf32, #tpu.memory_space<vmem>>, %arg7: memref<1x1xf32, #tpu.memory_space<smem>>, %arg8: memref<128x128xf32, #tpu.memory_space<vmem>>, %arg9: memref<2x128xf32, #tpu.memory_space<vmem>>, %arg10: memref<2x128x128xf32, #tpu.memory_space<vmem>>) attributes {dimension_semantics = [#tpu.dimension_semantics<parallel>, #tpu.dimension_semantics<arbitrary>], iteration_bounds = array<i64: 2, 2>, scalar_prefetch = 0 : i64, scratch_operands = 1 : i64, tpu.core_type = #tpu.core_type<tc>, window_params = [{transform_indices = @transform_0, window_bounds = array<i64: 2, 128, 128>}, {transform_indices = @transform_1, window_bounds = array<i64: 2, 128, 32>}, {pipeline_mode = #tpu.pipeline_mode<synchronous>, transform_indices = @transform_2, window_bounds = array<i64: 2, 32, 128>}, {pipeline_mode = #tpu.pipeline_mode<synchronous>, transform_indices = @transform_3, window_bounds = array<i64: 2, 128>}, {pipeline_mode = #tpu.pipeline_mode<synchronous>, transform_indices = @transform_4, window_bounds = array<i64: 1, 128>}, {transform_indices = @transform_5, window_bounds = array<i64: 1, 1>}, {transform_indices = @transform_6, window_bounds = array<i64: 128, 128>}, {transform_indices = @transform_7, window_bounds = array<i64: 2, 128>}]} {
    %c0_i32 = arith.constant 0 : i32
    %0 = arith.cmpi eq, %arg1, %c0_i32 : i32
    %1 = arith.extui %0 : i1 to i32
    %c0_i32_0 = arith.constant 0 : i32
    %2 = arith.cmpi ne, %1, %c0_i32_0 : i32
    scf.if %2 {
      %cst_33 = arith.constant 0.000000e+00 : f32
      %36 = vector.broadcast %cst_33 : f32 to vector<2x128x128xf32>
      %c0_34 = arith.constant 0 : index
      %c0_35 = arith.constant 0 : index
      %c0_36 = arith.constant 0 : index
      %37 = vector.load %arg10[%c0_34, %c0_35, %c0_36] : memref<2x128x128xf32, #tpu.memory_space<vmem>>, vector<2x128x128xf32>
      tpu.vector_store %arg10[%c0_34, %c0_35, %c0_36], %36 {strides = array<i32>} : memref<2x128x128xf32, #tpu.memory_space<vmem>>, vector<2x128x128xf32>,
    } else {
    }
    %c0 = arith.constant 0 : index
    %c0_1 = arith.constant 0 : index
    %c0_2 = arith.constant 0 : index
    %3 = vector.load %arg3[%c0, %c0_1, %c0_2] : memref<2x128x32xbf16, #tpu.memory_space<vmem>>, vector<1x128x32xbf16>
    %4 = vector.shape_cast %3 : vector<1x128x32xbf16> to vector<128x32xbf16>
    %c0_3 = arith.constant 0 : index
    %c0_4 = arith.constant 0 : index
    %c0_5 = arith.constant 0 : index
    %5 = vector.load %arg4[%c0_3, %c0_4, %c0_5] : memref<2x32x128xbf16, #tpu.memory_space<vmem>>, vector<1x32x128xbf16>
    %6 = vector.shape_cast %5 : vector<1x32x128xbf16> to vector<32x128xbf16>
    %cst = arith.constant dense<0.000000e+00> : vector<128x128xf32>
    %7 = tpu.matmul %4, %6, %cst {dimension_numbers = #tpu.dot_dimension_numbers<[1], [0], [0], [1], [0, 0, 1, 1], [], []>} : vector<128x32xbf16>, vector<32x128xbf16>, vector<128x128xf32> -> vector<128x128xf32>
    %8 = arith.truncf %7 : vector<128x128xf32> to vector<128x128xbf16>
    %c0_6 = arith.constant 0 : index
    %c0_7 = arith.constant 0 : index
    %c0_8 = arith.constant 0 : index
    %9 = vector.load %arg10[%c0_6, %c0_7, %c0_8] : memref<2x128x128xf32, #tpu.memory_space<vmem>>, vector<1x128x128xf32>
    %10 = vector.shape_cast %9 : vector<1x128x128xf32> to vector<128x128xf32>
    %c0_9 = arith.constant 0 : index
    %c0_10 = arith.constant 0 : index
    %c0_11 = arith.constant 0 : index
    %11 = vector.load %arg2[%c0_9, %c0_10, %c0_11] : memref<2x128x128xbf16, #tpu.memory_space<vmem>>, vector<1x128x128xbf16>
    %12 = vector.shape_cast %11 : vector<1x128x128xbf16> to vector<128x128xbf16>
    %cst_12 = arith.constant dense<0.000000e+00> : vector<128x128xf32>
    %13 = tpu.matmul %12, %8, %cst_12 {dimension_numbers = #tpu.dot_dimension_numbers<[1], [0], [0], [1], [0, 0, 1, 1], [], []>} : vector<128x128xbf16>, vector<128x128xbf16>, vector<128x128xf32> -> vector<128x128xf32>
    %14 = arith.addf %10, %13 : vector<128x128xf32>
    %c0_13 = arith.constant 0 : index
    %c0_14 = arith.constant 0 : index
    %c0_15 = arith.constant 0 : index
    %15 = vector.load %arg10[%c0_13, %c0_14, %c0_15] : memref<2x128x128xf32, #tpu.memory_space<vmem>>, vector<1x128x128xf32>
    %16 = vector.shape_cast %15 : vector<1x128x128xf32> to vector<128x128xf32>
    %17 = vector.shape_cast %14 : vector<128x128xf32> to vector<1x128x128xf32>
    tpu.vector_store %arg10[%c0_13, %c0_14, %c0_15], %17 {strides = array<i32>} : memref<2x128x128xf32, #tpu.memory_space<vmem>>, vector<1x128x128xf32>,
    %c1 = arith.constant 1 : index
    %c0_16 = arith.constant 0 : index
    %c0_17 = arith.constant 0 : index
    %18 = vector.load %arg3[%c1, %c0_16, %c0_17] : memref<2x128x32xbf16, #tpu.memory_space<vmem>>, vector<1x128x32xbf16>
    %19 = vector.shape_cast %18 : vector<1x128x32xbf16> to vector<128x32xbf16>
    %c1_18 = arith.constant 1 : index
    %c0_19 = arith.constant 0 : index
    %c0_20 = arith.constant 0 : index
    %20 = vector.load %arg4[%c1_18, %c0_19, %c0_20] : memref<2x32x128xbf16, #tpu.memory_space<vmem>>, vector<1x32x128xbf16>
    %21 = vector.shape_cast %20 : vector<1x32x128xbf16> to vector<32x128xbf16>
    %cst_21 = arith.constant dense<0.000000e+00> : vector<128x128xf32>
    %22 = tpu.matmul %19, %21, %cst_21 {dimension_numbers = #tpu.dot_dimension_numbers<[1], [0], [0], [1], [0, 0, 1, 1], [], []>} : vector<128x32xbf16>, vector<32x128xbf16>, vector<128x128xf32> -> vector<128x128xf32>
    %23 = arith.truncf %22 : vector<128x128xf32> to vector<128x128xbf16>
    %c1_22 = arith.constant 1 : index
    %c0_23 = arith.constant 0 : index
    %c0_24 = arith.constant 0 : index
    %24 = vector.load %arg10[%c1_22, %c0_23, %c0_24] : memref<2x128x128xf32, #tpu.memory_space<vmem>>, vector<1x128x128xf32>
    %25 = vector.shape_cast %24 : vector<1x128x128xf32> to vector<128x128xf32>
    %c1_25 = arith.constant 1 : index
    %c0_26 = arith.constant 0 : index
    %c0_27 = arith.constant 0 : index
    %26 = vector.load %arg2[%c1_25, %c0_26, %c0_27] : memref<2x128x128xbf16, #tpu.memory_space<vmem>>, vector<1x128x128xbf16>
    %27 = vector.shape_cast %26 : vector<1x128x128xbf16> to vector<128x128xbf16>
    %cst_28 = arith.constant dense<0.000000e+00> : vector<128x128xf32>
    %28 = tpu.matmul %27, %23, %cst_28 {dimension_numbers = #tpu.dot_dimension_numbers<[1], [0], [0], [1], [0, 0, 1, 1], [], []>} : vector<128x128xbf16>, vector<128x128xbf16>, vector<128x128xf32> -> vector<128x128xf32>
    %29 = arith.addf %25, %28 : vector<128x128xf32>
    %c1_29 = arith.constant 1 : index
    %c0_30 = arith.constant 0 : index
    %c0_31 = arith.constant 0 : index
    %30 = vector.load %arg10[%c1_29, %c0_30, %c0_31] : memref<2x128x128xf32, #tpu.memory_space<vmem>>, vector<1x128x128xf32>
    %31 = vector.shape_cast %30 : vector<1x128x128xf32> to vector<128x128xf32>
    %32 = vector.shape_cast %29 : vector<128x128xf32> to vector<1x128x128xf32>
    tpu.vector_store %arg10[%c1_29, %c0_30, %c0_31], %32 {strides = array<i32>} : memref<2x128x128xf32, #tpu.memory_space<vmem>>, vector<1x128x128xf32>,
    %c1_i32 = arith.constant 1 : i32
    %33 = arith.cmpi eq, %arg1, %c1_i32 : i32
    %34 = arith.extui %33 : i1 to i32
    %c0_i32_32 = arith.constant 0 : i32
    %35 = arith.cmpi ne, %34, %c0_i32_32 : i32
    scf.if %35 {
      %c0_33 = arith.constant 0 : index
      %c0_34 = arith.constant 0 : index
      %c0_35 = arith.constant 0 : index
      %36 = vector.load %arg10[%c0_33, %c0_34, %c0_35] : memref<2x128x128xf32, #tpu.memory_space<vmem>>, vector<2x128x128xf32>
      %c0_36 = arith.constant 0 : index
      %c0_37 = arith.constant 0 : index
      %37 = vector.load %arg5[%c0_36, %c0_37] : memref<2x128xf32, #tpu.memory_space<vmem>>, vector<2x128xf32>
      %38 = vector.shape_cast %37 : vector<2x128xf32> to vector<2x1x128xf32>
      %39 = vector.broadcast %38 : vector<2x1x128xf32> to vector<2x128x128xf32>
      %40 = arith.addf %36, %39 : vector<2x128x128xf32>
      %c0_38 = arith.constant 0 : index
      %c0_39 = arith.constant 0 : index
      %41 = vector.load %arg6[%c0_38, %c0_39] : memref<1x128xf32, #tpu.memory_space<vmem>>, vector<1x128xf32>
      %42 = vector.shape_cast %41 : vector<1x128xf32> to vector<1x1x128xf32>
      %c0_40 = arith.constant 0 : index
      %c0_41 = arith.constant 0 : index
      %43 = memref.load %arg7[%c0_40, %c0_41] : memref<1x1xf32, #tpu.memory_space<smem>>
      %44 = vector.broadcast %42 : vector<1x1x128xf32> to vector<2x128x128xf32>
      %45 = arith.mulf %40, %44 : vector<2x128x128xf32>
      %cst_42 = arith.constant dense<0.000000e+00> : vector<2x128xf32>
      %46 = vector.multi_reduction <add>, %45, %cst_42 [2] : vector<2x128x128xf32> to vector<2x128xf32>
      %47 = vector.shape_cast %46 : vector<2x128xf32> to vector<2x128x1xf32>
      %48 = vector.broadcast %43 : f32 to vector<2x128x1xf32>
      %49 = arith.addf %47, %48 : vector<2x128x1xf32>
      %cst_43 = arith.constant dense<0xFF800000> : vector<128x1xf32>
      %50 = vector.multi_reduction <maximumf>, %49, %cst_43 [0] : vector<2x128x1xf32> to vector<128x1xf32>
      %51 = vector.shape_cast %50 : vector<128x1xf32> to vector<1x128x1xf32>
      %52 = vector.broadcast %51 : vector<1x128x1xf32> to vector<2x128x1xf32>
      %53 = arith.subf %49, %52 : vector<2x128x1xf32>
      %54 = math.exp %53 : vector<2x128x1xf32>
      %cst_44 = arith.constant dense<0.000000e+00> : vector<128x1xf32>
      %55 = vector.multi_reduction <add>, %54, %cst_44 [0] : vector<2x128x1xf32> to vector<128x1xf32>
      %56 = vector.shape_cast %55 : vector<128x1xf32> to vector<1x128x1xf32>
      %57 = tpu.reciprocal %56 {approx = true} : vector<1x128x1xf32> -> vector<1x128x1xf32>
      %58 = vector.broadcast %57 : vector<1x128x1xf32> to vector<2x128x1xf32>
      %59 = arith.mulf %54, %58 : vector<2x128x1xf32>
      %60 = vector.broadcast %59 : vector<2x128x1xf32> to vector<2x128x128xf32>
      %61 = arith.mulf %40, %60 : vector<2x128x128xf32>
      %cst_45 = arith.constant dense<0.000000e+00> : vector<128x128xf32>
      %62 = vector.multi_reduction <add>, %61, %cst_45 [0] : vector<2x128x128xf32> to vector<128x128xf32>
      %c0_46 = arith.constant 0 : index
      %c0_47 = arith.constant 0 : index
      %63 = vector.load %arg8[%c0_46, %c0_47] : memref<128x128xf32, #tpu.memory_space<vmem>>, vector<128x128xf32>
      tpu.vector_store %arg8[%c0_46, %c0_47], %62 {strides = array<i32>} : memref<128x128xf32, #tpu.memory_space<vmem>>, vector<128x128xf32>,
      %64 = vector.shape_cast %59 : vector<2x128x1xf32> to vector<2x128xf32>
      %c0_48 = arith.constant 0 : index
      %c0_49 = arith.constant 0 : index
      %65 = vector.load %arg9[%c0_48, %c0_49] : memref<2x128xf32, #tpu.memory_space<vmem>>, vector<2x128xf32>
      tpu.vector_store %arg9[%c0_48, %c0_49], %64 {strides = array<i32>} : memref<2x128xf32, #tpu.memory_space<vmem>>, vector<2x128xf32>,
    } else {
    }
    return
  }
  func.func @transform_0(%arg0: i32, %arg1: i32) -> (i32, i32, i32) {
    %c0_i32 = arith.constant 0 : i32
    %c0_i32_0 = arith.constant 0 : i32
    return %c0_i32, %arg0, %arg1 : i32, i32, i32
  }
  func.func @transform_1(%arg0: i32, %arg1: i32) -> (i32, i32, i32) {
    %c0_i32 = arith.constant 0 : i32
    %c0_i32_0 = arith.constant 0 : i32
    %c0_i32_1 = arith.constant 0 : i32
    return %c0_i32, %arg1, %c0_i32_0 : i32, i32, i32
  }
  func.func @transform_2(%arg0: i32, %arg1: i32) -> (i32, i32, i32) {
    %c0_i32 = arith.constant 0 : i32
    %c0_i32_0 = arith.constant 0 : i32
    %c0_i32_1 = arith.constant 0 : i32
    %c0_i32_2 = arith.constant 0 : i32
    return %c0_i32, %c0_i32_0, %c0_i32_1 : i32, i32, i32
  }
  func.func @transform_3(%arg0: i32, %arg1: i32) -> (i32, i32) {
    %c0_i32 = arith.constant 0 : i32
    %c0_i32_0 = arith.constant 0 : i32
    %c0_i32_1 = arith.constant 0 : i32
    return %c0_i32, %c0_i32_0 : i32, i32
  }
  func.func @transform_4(%arg0: i32, %arg1: i32) -> (i32, i32) {
    %c0_i32 = arith.constant 0 : i32
    %c0_i32_0 = arith.constant 0 : i32
    %c0_i32_1 = arith.constant 0 : i32
    return %c0_i32, %c0_i32_0 : i32, i32
  }
  func.func @transform_5(%arg0: i32, %arg1: i32) -> (i32, i32) {
    %c0_i32 = arith.constant 0 : i32
    %c0_i32_0 = arith.constant 0 : i32
    %c0_i32_1 = arith.constant 0 : i32
    return %c0_i32, %c0_i32_0 : i32, i32
  }
  func.func @transform_6(%arg0: i32, %arg1: i32) -> (i32, i32) {
    %c0_i32 = arith.constant 0 : i32
    %c0_i32_0 = arith.constant 0 : i32
    return %arg0, %c0_i32 : i32, i32
  }
  func.func @transform_7(%arg0: i32, %arg1: i32) -> (i32, i32) {
    %c0_i32 = arith.constant 0 : i32
    %c0_i32_0 = arith.constant 0 : i32
    return %c0_i32, %arg0 : i32, i32
  }
}

</mosaic_0001>

<bundles_post_ra>
// kernel: tpu_custom_call.1
= control target key start
LH: loop header
LB: loop body
LE: loop exit
PB: predicated region body
PF: predicated region fallthrough
CT: control target
= control target key end

     0   :  { %s4039_s0 = inlined_call_operand.hbm [shape: bf16[2,256,256], index: 0, kind: input, shape index: {}]   ;;  %s4040_s1 = inlined_call_operand.vmem [shape: bf16[2,256,32], index: 1, kind: input, shape index: {}]   ;;  %s4041_s2 = inlined_call_operand.vmem [shape: bf16[2,32,128], index: 2, kind: input, shape index: {}]   ;;  %s4042_s3 = inlined_call_operand.vmem [shape: f32[2,128], index: 3, kind: input, shape index: {}]   ;;  %s4043_s4 = inlined_call_operand.vmem [shape: f32[1,128], index: 4, kind: input, shape index: {}]   ;;  %s4044_s5 = inlined_call_operand.<no memory space> [shape: f32[1,1], index: 5, kind: input, shape index: {}]   ;;  %s4045_s6 = inlined_call_operand.hbm [shape: f32[256,128], index: 6, kind: output, shape index: {0}]   ;;  %s4046_s7 = inlined_call_operand.hbm [shape: f32[2,256], index: 7, kind: output, shape index: {1}]  }
   0x1   :  { %4061 = sst [smem:[#allocation29_spill]] %s4039_s0 }
   0x2   :  { %4062 = sst [smem:[#allocation30_spill]] %s4045_s6 }
   0x3   :  { %4063 = sst [smem:[#allocation31_spill]] %s4046_s7 }
   0x4   :  { %13 = sst [smem:[#allocation3]] %s4044_s5 }
   0x5   :  { %14 = vsyncpa [#allocation5], 0 }
   0x6   :  { %16 = vsyncpa [#allocation5 + $0x1], 0 }
   0x7   :  { %17 = vsyncpa [#allocation6], 0 }
   0x8   :  { %19 = vsyncpa [#allocation6 + $0x1], 0 }
   0x9   :  { %20 = vsyncpa [#allocation10], 0 }
   0xa   :  { %22 = vsyncpa [#allocation10 + $0x1], 0  ;;  %s3060_s26 = smov 0   ;;  %s3062_s27 = smov 0  }
   0xb   :  { %s3064_s28 = smov 0   ;;  %s3066_s29 = smov 0  }
   0xc   :  { %s3068_s30 = smov 0   ;;  %s3070_s8 = smov 0  }
   0xd   :  { %s3072_s9 = smov 0   ;;  %s3074_s5 = smov 0  }
   0xe   :  { %s3076_s10 = smov 0   ;;  %s3078_s11 = smov 0  }
   0xf   :  { %s3080_s12 = smov 0   ;;  %s3082_s13 = smov 0  }
  0x10   :  { %s3084_s14 = smov 0  }
  0x11 LB: > { %4064 = sst [smem:[#allocation17_spill]] %s2954_s26  ;;  %s4047_s15 = sadd.s32 4294967295, %s3002_s14   ;;  %s3002_s14 = sphi %s3084_s14, %s28_s14   ;;  %s2998_s13 = sphi %s3082_s13, %s4100_s13   ;;  %s2994_s12 = sphi %s3080_s12, %s4109_s12   ;;  %s2990_s11 = sphi %s3078_s11, %s4098_s11   ;;  %s2986_s10 = sphi %s3076_s10, %s4108_s10   ;;  %s2982_s5 = sphi %s3074_s5, %s4107_s5   ;;  %s2978_s9 = sphi %s3072_s9, %s4106_s9   ;;  %s2974_s8 = sphi %s3070_s8, %s4105_s8   ;;  %s2970_s30 = sphi %s3068_s30, %s4104_s30   ;;  %s2966_s29 = sphi %s3066_s29, %s4103_s29   ;;  %s2962_s28 = sphi %s3064_s28, %s4095_s28   ;;  %s2958_s27 = sphi %s3062_s27, %s4102_s27   ;;  %s2954_s26 = sphi %s3060_s26, %s4101_s26  }
  0x12   : > { %4065 = sst [smem:[#allocation18_spill]] %s2962_s28  ;;  %s37_s17 = sadd.s32 1, %s2994_s12 }
  0x13   : > { %4066 = sst [smem:[#allocation19_spill]] %s2998_s13  ;;  %s40_s18 = sadd.s32 1, %s2998_s13 }
  0x14   : > { %p38_p0 = scmp.ge.s32.totalorder %s37_s17, 2  ;;  %s49_s19 = sadd.s32 1, %s2982_s5 }
  0x15   : > { %p56_p1 = scmp.ne.s32.totalorder %s2982_s5, %s2978_s9  ;;  %p57_p2 = scmp.eq.s32.totalorder %s3002_s14, 0 }
  0x16   : > { %s4111_s17 = smov (%p38_p0, %s37_s17), 0  ;;  %s4113_s18 = smov (!%p38_p0, %s40_s18), %s2998_s13 }
  0x17   : > { %4067 = sst [smem:[#allocation20_spill]] %s4111_s17  ;;  %s45_s20 = ssub.s32 %s2994_s12, %s4111_s17 }
  0x18   : > { %p3138_p3 = por %p57_p2, %p56_p1  ;;  %p42_p4 = scmp.ge.s32.totalorder %s4113_s18, 2 }
  0x19   : > { %p62_p5 = scmp.ne.s32.totalorder %s2978_s9, %s2974_s8  ;;  %p63_p6 = scmp.eq.s32.totalorder %s4047_s15, 0 }
  0x1a   : > { %p73_p7 = scmp.eq.s32.totalorder %s45_s20, 0  ;;  %s4115_s18 = smov (%p42_p4, %s4113_s18), 0 }
  0x1b   : > { %4069 = sst [smem:[#allocation21_spill]] %s4115_s18  ;;  %p3147_p8 = por %p63_p6, %p62_p5 }
  0x1c   : > { %s75_s23 = sadd.s32 1, %s2970_s30  ;;  %s44_s24 = ssub.s32 %s2998_s13, %s4115_s18 }
  0x1d   : > { %p82_p9 = scmp.ne.s32.totalorder %s2970_s30, %s2966_s29  ;;  %s46_s25 = sor.u32 %s45_s20, %s44_s24 }
  0x1e   : > { %p183_p10 = scmp.eq.s32.totalorder %s44_s24, 0  ;;  %p47_p11 = scmp.eq.s32.totalorder %s46_s25, 0 }
  0x1f   : > { %p3158_p12 = por %p82_p9, %p57_p2  ;;  %s185_s17 = sadd.s32 1, %s2962_s28 }
  0x20   : > { %s3163_s16 = scalar_select %p73_p7, %s2970_s30, %s75_s23  }
  0x21   : > { %s3166_s15 = scalar_select %p47_p11, %s2982_s5, %s49_s19  }
  0x22   : > { %4072 = sst [smem:[#allocation22_spill]] %s3163_s16  ;;  %p195_p13 = scmp.ne.s32.totalorder %s2962_s28, %s2958_s27 }
  0x23   : > { %4073 = sst [smem:[#allocation23_spill]] %s3166_s15  ;;  %s4075_s6 = sadd.s32 4294967295, %s3002_s14  }
  0x24   : > { %s3172_s7 = scalar_select %p183_p10, %s2962_s28, %s185_s17  }
  0x25   : > { %p196_p0 = scmp.eq.s32.totalorder %s4075_s6, 3  ;;  %p201_p1 = scmp.ne.s32.totalorder %s2958_s27, %s2954_s26 }
  0x26   : > { %4074 = sst [smem:[#allocation24_spill]] %s3172_s7  ;;  %s4076_s18 = sadd.s32 4294967294, %s3002_s14  }
  0x27   : > { %p202_p4 = scmp.eq.s32.totalorder %s4076_s18, 3  ;;  %p3180_p5 = por %p196_p0, %p195_p13 }
  0x28   : > { %p2279_p6 = scmp.ge.s32.totalorder %s3002_s14, 4 }
  0x29   : > { %s4077_s20 = scalar_select %p3180_p5, 1, 0 }
  0x2a   : > { %p3184_p2 = por %p202_p4, %p201_p1  ;;  %256 = sbr.rel (%p2279_p6) target bundleno = 74 (0x4a), region = 32 }
  0x2b   : > { %4078 = sst [smem:[#allocation25_spill]] %s4077_s20 }
  0x2c   : > { %s4079_s24 = scalar_select %p3184_p2, 1, 0 }
  0x2e   : > { %4080 = sst [smem:[#allocation26_spill]] %s4079_s24 }
  0x2f   : > { %s260_s6 = sand.u32 1, %s2982_s5   ;;  %s2393_s17 = sshll.u32 %s2998_s13, 5 }
  0x30   : > { %s2280_s18 = sshll.u32 %s260_s6, 7  ;;  %s270_s19 = sadd.s32 %s2994_s12, %s2393_s17 }
  0x31   : > { %s2283_s23 = sshll.u32 %s270_s19, 6  ;;  %s4081_s0 = sld [smem:[#allocation29_spill]] }
  0x32   : > { %s264_s7 = scalar_lea.vmem [#allocation4], %s2280_s18  ;;  %s3004_s20 = smov 4096  }
  0x33   : > { %s285_s28 = sshll.u32 %s264_s7, 4  ;;  %2569 = sst [smem:[#allocation12]] (%p3138_p3), %s3004_s20  ;;  %s286_s28 = int_to_ptr.vmem [resolvable:$true] %s285_s28 }
  0x34   : > { %s2568_s24 = scalar_select %p3138_p3, [#allocation0], [#allocation13] }
  0x35   : > { %s3005_s13 = smov 1024   ;;  %s3006_s17 = smov 16  }
  0x36   : > { %s277_s26 = sld [smem:[%s2568_s24]]   ;;  %s3007_s15 = smov 128  }
  0x37   : > { %s272_s16 = scalar_lea.hbm %s4081_s0, %s2283_s23  ;;  %2570 = sst [smem:[#allocation12 + $0x1]] (%p3138_p3), %s3005_s13 }
  0x38   : > { %2571 = sst [smem:[#allocation12 + $0x2]] (%p3138_p3), %s3006_s17  ;;  %s3008_s18 = smov 64  }
  0x39   : > { %2572 = sst [smem:[#allocation12 + $0x3]] (%p3138_p3), %s3007_s15  ;;  %s3009_s19 = smov 4  }
  0x3a   : > { %2573 = sst [smem:[#allocation12 + $0x4]] (%p3138_p3), %s3008_s18  ;;  %s261_s20 = scalar_lea.sflag [#allocation5], %s260_s6 }
  0x3b   : > { %2574 = sst [smem:[#allocation12 + $0x5]] (%p3138_p3), %s3009_s19  ;;  %s3010_s23 = smov 131072  }
  0x3c   : > { %s2284_s7 = sshll.u32 %s277_s26, 26  ;;  %307 = sbr.rel (!%p3158_p12) target bundleno = 74 (0x4a), region = 40 }
  0x3d   : > { %s2285_s24 = sadd.s32 134217728, %s2284_s7  ;;  %s309_s13 = sand.u32 (%p3158_p12), 1, %s2970_s30  }
  0x3e   : > { %2575 = dma.general (%p3138_p3), %s272_s16, 2048, %s286_s28, %s261_s20, %s3010_s23, [#allocation12], %s2285_s24, 0  }
  0x3f   : > { %s2394_s25 = sshll.u32 (%p3158_p12), %s2994_s12, 6  ;;  %s2286_s17 = sshll.u32 (%p3158_p12), %s309_s13, 7 }
  0x40   : > { %s3218_s26 = scalar_lea.vmem (%p3158_p12), %s4040_s1, %s2394_s25  ;;  %s311_s28 = scalar_lea.vmem (%p3158_p12), [#allocation7], %s2286_s17 }
  0x41   : > { %v331_v0 = vld [vmem:[%s3218_s26] sm:$0xff]   ;;  %v335_v1 = vld [vmem:[%s3218_s26 + $0x8] sm:$0xff]   ;;  %v339_v2 = vld [vmem:[%s3218_s26 + $0x10] sm:$0xff]  }
  0x42   : > { %332 = vst [vmem:[%s311_s28] sm:$0xff] %v331_v0   ;;  %336 = vst [vmem:[%s311_s28 + $0x8] sm:$0xff] %v335_v1   ;;  %v343_v3 = vld [vmem:[%s3218_s26 + $0x18] sm:$0xff]   ;;  %v347_v4 = vld [vmem:[%s3218_s26 + $0x20] sm:$0xff]  }
  0x43   : > { %340 = vst [vmem:[%s311_s28 + $0x10] sm:$0xff] %v339_v2   ;;  %v351_v5 = vld [vmem:[%s3218_s26 + $0x28] sm:$0xff]   ;;  %344 = vst [vmem:[%s311_s28 + $0x18] sm:$0xff] %v343_v3   ;;  %v355_v6 = vld [vmem:[%s3218_s26 + $0x30] sm:$0xff]  }
  0x44   : > { %348 = vst [vmem:[%s311_s28 + $0x20] sm:$0xff] %v347_v4   ;;  %352 = vst [vmem:[%s311_s28 + $0x28] sm:$0xff] %v351_v5   ;;  %v359_v7 = vld [vmem:[%s3218_s26 + $0x38] sm:$0xff]   ;;  %v363_v8 = vld [vmem:[%s3218_s26 + $0x80] sm:$0xff]  }
  0x45   : > { %356 = vst [vmem:[%s311_s28 + $0x30] sm:$0xff] %v355_v6   ;;  %360 = vst [vmem:[%s311_s28 + $0x38] sm:$0xff] %v359_v7   ;;  %v367_v9 = vld [vmem:[%s3218_s26 + $0x88] sm:$0xff]   ;;  %v371_v10 = vld [vmem:[%s3218_s26 + $0x90] sm:$0xff]  }
  0x46   : > { %364 = vst [vmem:[%s311_s28 + $0x40] sm:$0xff] %v363_v8   ;;  %v375_v11 = vld [vmem:[%s3218_s26 + $0x98] sm:$0xff]   ;;  %368 = vst [vmem:[%s311_s28 + $0x48] sm:$0xff] %v367_v9   ;;  %v379_v12 = vld [vmem:[%s3218_s26 + $0xa0] sm:$0xff]  }
  0x47   : > { %372 = vst [vmem:[%s311_s28 + $0x50] sm:$0xff] %v371_v10   ;;  %376 = vst [vmem:[%s311_s28 + $0x58] sm:$0xff] %v375_v11   ;;  %v383_v13 = vld [vmem:[%s3218_s26 + $0xa8] sm:$0xff]   ;;  %v387_v14 = vld [vmem:[%s3218_s26 + $0xb0] sm:$0xff]  }
  0x48   : > { %380 = vst [vmem:[%s311_s28 + $0x60] sm:$0xff] %v379_v12   ;;  %384 = vst [vmem:[%s311_s28 + $0x68] sm:$0xff] %v383_v13   ;;  %v391_v15 = vld [vmem:[%s3218_s26 + $0xb8] sm:$0xff]  }
  0x49   : > { %388 = vst [vmem:[%s311_s28 + $0x70] sm:$0xff] %v387_v14   ;;  %392 = vst [vmem:[%s311_s28 + $0x78] sm:$0xff] %v391_v15  }
  0x4a PF: > { %p2289_p3 = scmp.ge.s32.totalorder %s3002_s14, 1  ;;  %p481_p7 = scmp.lt.s32.totalorder %s3002_s14, 5 }
  0x4c   : > { %p482_p9 = pnand %p2289_p3, %p481_p7 }
  0x4d   : > { %s487_s0 = sand.u32 (!%p482_p9), 1, %s2978_s9  }
  0x4e   : > { %485 = sbr.rel (%p482_p9) target bundleno = 945 (0x3b1), region = 81  ;;  %s2290_s16 = sshll.u32 (!%p482_p9), %s487_s0, 7 }
  0x4f   : > { %s488_s21 = scalar_lea.sflag (!%p482_p9), [#allocation5], %s487_s0  ;;  %s3239_s8 = scalar_lea.vmem (!%p482_p9), [#allocation4], %s2290_s16 }
  0x53   : > { %2941 = dma.done.wait (%p3147_p8), %s488_s21, 2048  }
  0x54   : > { %2943 = vsyncadd (%p3147_p8), %s488_s21, 4294965248  ;;  %s497_s6 = sand.u32 1, %s2966_s29   ;;  %s3247_s18 = sand.u32 1, %s2958_s27  }
  0x55   : > { %s2291_s7 = sshll.u32 %s497_s6, 7  ;;  %s2292_s19 = sshll.u32 %s3247_s18, 7 }
  0x56   : > { %s2293_s24 = sshll.u32 %s3247_s18, 1  ;;  %s3251_s20 = scalar_lea.vmem [#allocation7], %s2291_s7 }
  0x57   : > { %s3253_s23 = scalar_lea.vmem [#allocation8], %s2292_s19  ;;  %s3255_s13 = scalar_lea.vmem [#allocation9], %s2293_s24 }
  0x58   : > { %p2294_p10 = scmp.ne.s32.totalorder %s2986_s10, 0 }
  0x5a   : > { %545 = sbr.rel (%p2294_p10) target bundleno = 112 (0x70), region = 93 }
  0x5f   : > { %v3011_v16 = vmov 0.0  }
  0x60   : > { %546 = vst [vmem:[#allocation2 + $0xb0] sm:$0xff] %v3011_v16  ;;  %547 = vst [vmem:[#allocation2] sm:$0xff] %v3011_v16 }
  0x61   : > { %548 = vst [vmem:[#allocation2 + $0xd8] sm:$0xff] %v3011_v16  ;;  %549 = vst [vmem:[#allocation2 + $0x18] sm:$0xff] %v3011_v16 }
  0x62   : > { %550 = vst [vmem:[#allocation2 + $0x50] sm:$0xff] %v3011_v16  ;;  %551 = vst [vmem:[#allocation2 + $0x68] sm:$0xff] %v3011_v16 }
  0x63   : > { %552 = vst [vmem:[#allocation2 + $0x30] sm:$0xff] %v3011_v16  ;;  %553 = vst [vmem:[#allocation2 + $0x48] sm:$0xff] %v3011_v16 }
  0x64   : > { %554 = vst [vmem:[#allocation2 + $0x80] sm:$0xff] %v3011_v16  ;;  %555 = vst [vmem:[#allocation2 + $0x88] sm:$0xff] %v3011_v16 }
  0x65   : > { %556 = vst [vmem:[#allocation2 + $0xe8] sm:$0xff] %v3011_v16  ;;  %557 = vst [vmem:[#allocation2 + $0xb8] sm:$0xff] %v3011_v16 }
  0x66   : > { %558 = vst [vmem:[#allocation2 + $0x60] sm:$0xff] %v3011_v16  ;;  %559 = vst [vmem:[#allocation2 + $0xf0] sm:$0xff] %v3011_v16 }
  0x67   : > { %560 = vst [vmem:[#allocation2 + $0x8] sm:$0xff] %v3011_v16  ;;  %561 = vst [vmem:[#allocation2 + $0x78] sm:$0xff] %v3011_v16 }
  0x68   : > { %562 = vst [vmem:[#allocation2 + $0x38] sm:$0xff] %v3011_v16  ;;  %563 = vst [vmem:[#allocation2 + $0x58] sm:$0xff] %v3011_v16 }
  0x69   : > { %564 = vst [vmem:[#allocation2 + $0x40] sm:$0xff] %v3011_v16  ;;  %565 = vst [vmem:[#allocation2 + $0xc8] sm:$0xff] %v3011_v16 }
  0x6a   : > { %566 = vst [vmem:[#allocation2 + $0xe0] sm:$0xff] %v3011_v16  ;;  %567 = vst [vmem:[#allocation2 + $0x90] sm:$0xff] %v3011_v16 }
  0x6b   : > { %568 = vst [vmem:[#allocation2 + $0x70] sm:$0xff] %v3011_v16  ;;  %569 = vst [vmem:[#allocation2 + $0xc0] sm:$0xff] %v3011_v16 }
  0x6c   : > { %570 = vst [vmem:[#allocation2 + $0xa8] sm:$0xff] %v3011_v16  ;;  %571 = vst [vmem:[#allocation2 + $0xd0] sm:$0xff] %v3011_v16 }
  0x6d   : > { %572 = vst [vmem:[#allocation2 + $0x10] sm:$0xff] %v3011_v16  ;;  %573 = vst [vmem:[#allocation2 + $0x28] sm:$0xff] %v3011_v16 }
  0x6e   : > { %574 = vst [vmem:[#allocation2 + $0xa0] sm:$0xff] %v3011_v16  ;;  %575 = vst [vmem:[#allocation2 + $0xf8] sm:$0xff] %v3011_v16 }
  0x6f   : > { %576 = vst [vmem:[#allocation2 + $0x20] sm:$0xff] %v3011_v16  ;;  %577 = vst [vmem:[#allocation2 + $0x98] sm:$0xff] %v3011_v16 }
  0x70 PF: > { %v2704_v17 = vld [vmem:[%s4041_s2 + $0x8] sm:$0xff]   ;;  %v2705_v18 = vld [vmem:[%s4041_s2] sm:$0xff]   ;;  %vm650_vm0 = vcmask 261120   ;;  %v2708_v20 = vld [vmem:[%s4041_s2 + $0x18] sm:$0xff]   ;;  %p2383_p8 = scmp.ne.s32.totalorder %s2986_s10, 1 }
  0x71   : > { %2448 = vmatprep.subr.bf16.mxu0 %v2704_v17  ;;  %v2706_v19 = vld [vmem:[%s3251_s20] sm:$0xff]   ;;  %v2707_v21 = vld [vmem:[%s3251_s20 + $0x8] sm:$0xff]   ;;  %v2709_v22 = vld [vmem:[%s3251_s20 + $0x10] sm:$0xff]  }
  0x72   : > { %2449 = vmatpush3.bf16.msra.mxu0 %v2704_v17  ;;  %2452 = vmatprep.mubr.msk.bf16.mxu0 %vm650_vm0, %v2706_v19  ;;  %v2713_v23 = vld [vmem:[%s4041_s2 + $0x10] sm:$0xff]   ;;  %v2710_v24 = vld [vmem:[%s3251_s20 + $0x18] sm:$0xff]   ;;  %v2711_v25 = vld [vmem:[%s3251_s20 + $0x20] sm:$0xff]  }
  0x73   : > { %2450 = vmatprep.subr.bf16.mxu0 %v2705_v18  ;;  %v2712_v26 = vld [vmem:[%s3251_s20 + $0x28] sm:$0xff]   ;;  %v2714_v27 = vld [vmem:[%s3251_s20 + $0x30] sm:$0xff]   ;;  %v2715_v28 = vld [vmem:[%s3251_s20 + $0x38] sm:$0xff]  }
  0x74   : > { %v2716_v29 = vld [vmem:[%s3251_s20 + $0x40] sm:$0xff]   ;;  %v2717_v30 = vld [vmem:[%s3251_s20 + $0x48] sm:$0xff]   ;;  %v2718_v31 = vld [vmem:[%s3251_s20 + $0x50] sm:$0xff]  }
  0x75   : > { %v2719_v32 = vld [vmem:[%s3251_s20 + $0x58] sm:$0xff]   ;;  %v2720_v33 = vld [vmem:[%s3251_s20 + $0x60] sm:$0xff]   ;;  %v2721_v34 = vld [vmem:[%s3251_s20 + $0x68] sm:$0xff]  }
  0x76   : > { %2451 = vmatpush3.bf16.msra.mxu0 %v2705_v18  ;;  %v2722_v35 = vld [vmem:[%s3251_s20 + $0x70] sm:$0xff]   ;;  %v2723_v36 = vld [vmem:[%s3251_s20 + $0x78] sm:$0xff]   ;;  %v2724_v37 = vld [vmem:[%s3239_s8] sm:$0xff]  }
  0x77   : > { %2500 = vmatprep.subr.bf16.mxu0 %v2708_v20  ;;  %2484 = vmatprep.mubr.bf16.mxu1 %v2724_v37  ;;  %v2736_v38 = vld [vmem:[%s3239_s8 + $0x40] sm:$0xff]   ;;  %v2725_v13 = vld [vmem:[%s3239_s8 + $0x8] sm:$0xff]   ;;  %v2726_v17 = vld [vmem:[%s3239_s8 + $0x10] sm:$0xff]  }
  0x78   : > { %v782_v37 = vld [vmem:[#allocation2 + $0xd8] sm:$0xff] }
  0x79   : > { %2453 = vmatmul.mubr.msk.bf16.vlgmr.msra.gmra.mxu0 %vm650_vm0, %v2707_v21  ;;  %v2728_v21 = vld [vmem:[%s3239_s8 + $0x20] sm:$0xff]  }
  0x7a   : > { %2501 = vmatpush3.bf16.msra.mxu0 %v2708_v20  ;;  %2456 = vmatprep.mubr.msk.bf16.mxu0 %vm650_vm0, %v2709_v22  ;;  %v2727_v20 = vld [vmem:[%s3239_s8 + $0x18] sm:$0xff]  }
  0x7b   : > { %2502 = vmatprep.subr.bf16.mxu0 %v2713_v23 }
  0x7e   : > { %2503 = vmatpush3.bf16.msra.mxu0 %v2713_v23 }
  0x81   : > { %2457 = vmatmul.mubr.msk.bf16.gmra.mxu0 %vm650_vm0, %v2710_v24  ;;  %v2729_v24 = vld [vmem:[%s3239_s8 + $0x28] sm:$0xff]  }
  0x82   : > { %2460 = vmatprep.mubr.msk.bf16.mxu0 %vm650_vm0, %v2711_v25  ;;  %v2730_v25 = vld [vmem:[%s3239_s8 + $0x30] sm:$0xff]  }
  0x89   : > { %2461 = vmatmul.mubr.msk.bf16.gmra.mxu0 %vm650_vm0, %v2712_v26 }
  0x8a   : > { %2464 = vmatprep.mubr.msk.bf16.mxu0 %vm650_vm0, %v2714_v27 }
  0x91   : > { %2465 = vmatmul.mubr.msk.bf16.gmra.mxu0 %vm650_vm0, %v2715_v28  ;;  %v2731_v28 = vld [vmem:[%s3239_s8 + $0x38] sm:$0xff]  }
  0x92   : > { %2504 = vmatprep.mubr.msk.bf16.mxu0 %vm650_vm0, %v2716_v29  ;;  %v2732_v29 = vld [vmem:[%s3239_s8 + $0x50] sm:$0xff]  }
  0x99   : > { %2505 = vmatmul.mubr.msk.bf16.vlgmr.msra.gmra.mxu0 %vm650_vm0, %v2717_v30 }
  0x9a   : > { %2508 = vmatprep.mubr.msk.bf16.mxu0 %vm650_vm0, %v2718_v31  ;;  %v2737_v31 = vld [vmem:[%s3239_s8 + $0x48] sm:$0xff]  }
  0xa1   : > { %2509 = vmatmul.mubr.msk.bf16.gmra.mxu0 %vm650_vm0, %v2719_v32  ;;  %v2733_v32 = vld [vmem:[%s3239_s8 + $0x58] sm:$0xff]  }
  0xa2   : > { %2512 = vmatprep.mubr.msk.bf16.mxu0 %vm650_vm0, %v2720_v33  ;;  %v2734_v33 = vld [vmem:[%s3239_s8 + $0x60] sm:$0xff]  }
  0xa9   : > { %2513 = vmatmul.mubr.msk.bf16.gmra.mxu0 %vm650_vm0, %v2721_v34  ;;  %v2735_v34 = vld [vmem:[%s3239_s8 + $0x68] sm:$0xff]  }
  0xaa   : > { %2516 = vmatprep.mubr.msk.bf16.mxu0 %vm650_vm0, %v2722_v35  ;;  %v2738_v35 = vld [vmem:[%s3239_s8 + $0x70] sm:$0xff]  }
  0xb1   : > { %2517 = vmatmul.mubr.msk.bf16.gmra.mxu0 %vm650_vm0, %v2723_v36  ;;  %v2739_v36 = vld [vmem:[%s3239_s8 + $0x78] sm:$0xff]  }
  0xb2   : > { %2536 = vmatprep.mubr.bf16.mxu0 %v2736_v38 }
 0x139   : > { %v2454_v39 = vpop.f32.mrf.mxu0 }
 0x13b   : > { %v709_v40 = vpop.f32.mrf.mxu0 }
 0x13d   : > { %v2455_v41 = vpop.f32.mrf.mxu0 }
 0x13e   : > { %v773_v7 = vpack.c.bf16 %v2455_v41, %v2454_v39  ;;  %v780_v39 = vld [vmem:[#allocation2 + $0xb0] sm:$0xff] }
 0x13f   : > { %v712_v42 = vpop.f32.mrf.mxu0 }
 0x140   : > { %v772_v10 = vpack.c.bf16 %v712_v42, %v709_v40  ;;  %v783_v42 = vld [vmem:[#allocation2 + $0x18] sm:$0xff] }
 0x141   : > { %v2458_v43 = vpop.f32.mrf.mxu0 }
 0x143   : > { %v725_v44 = vpop.f32.mrf.mxu0 }
 0x145   : > { %v2459_v45 = vpop.f32.mrf.mxu0 }
 0x146   : > { %v775_v1 = vpack.c.bf16 %v2459_v45, %v2458_v43  ;;  %v781_v45 = vld [vmem:[#allocation2] sm:$0xff] }
 0x147   : > { %v728_v46 = vpop.f32.mrf.mxu0 }
 0x148   : > { %v774_v4 = vpack.c.bf16 %v728_v46, %v725_v44 }
 0x149   : > { %v2462_v47 = vpop.f32.mrf.mxu0 }
 0x14b   : > { %v741_v48 = vpop.f32.mrf.mxu0 }
 0x14d   : > { %v2463_v49 = vpop.f32.mrf.mxu0 }
 0x14e   : > { %v777_v59 = vpack.c.bf16 %v2463_v49, %v2462_v47 }
 0x14f   : > { %v744_v50 = vpop.f32.mrf.mxu0 }
 0x150   : > { %v776_v62 = vpack.c.bf16 %v744_v50, %v741_v48  ;;  %v786_v48 = vld [vmem:[#allocation2 + $0x30] sm:$0xff] }
 0x151   : > { %v2466_v51 = vpop.f32.mrf.mxu0 }
 0x153   : > { %v757_v52 = vpop.f32.mrf.mxu0 }
 0x155   : > { %v2467_v53 = vpop.f32.mrf.mxu0 }
 0x156   : > { %v779_v54 = vpack.c.bf16 %v2467_v53, %v2466_v51  ;;  %v784_v51 = vld [vmem:[#allocation2 + $0x50] sm:$0xff] }
 0x157   : > { %v760_v55 = vpop.f32.mrf.mxu0 }
 0x158   : > { %v778_v56 = vpack.c.bf16 %v760_v55, %v757_v52  ;;  %2468 = vmatprep.subr.bf16.mxu1 %v779_v54 }
 0x159   : > { %2469 = vmatpush3.bf16.msra.mxu1 %v779_v54  ;;  %v3304_v57 = vpop.f32.mrf.mxu0  ;;  %v787_v54 = vld [vmem:[#allocation2 + $0x48] sm:$0xff] }
 0x15a   : > { %2470 = vmatprep.subr.bf16.mxu1 %v778_v56 }
 0x15b   : > { %v3306_v58 = vpop.f32.mrf.mxu0 }
 0x15d   : > { %2471 = vmatpush3.bf16.msra.mxu1 %v778_v56  ;;  %v3308_v60 = vpop.f32.mrf.mxu0 }
 0x15e   : > { %2472 = vmatprep.subr.bf16.mxu1 %v777_v59  ;;  %v1185_v27 = vpack.c.bf16 %v3308_v60, %v3304_v57  ;;  %v785_v57 = vld [vmem:[#allocation2 + $0x68] sm:$0xff] }
 0x15f   : > { %v3310_v61 = vpop.f32.mrf.mxu0  ;;  %v790_v60 = vld [vmem:[#allocation2 + $0xe8] sm:$0xff] }
 0x160   : > { %v1184_v30 = vpack.c.bf16 %v3310_v61, %v3306_v58 }
 0x161   : > { %2473 = vmatpush3.bf16.msra.mxu1 %v777_v59  ;;  %v2510_v63 = vpop.f32.mrf.mxu0 }
 0x162   : > { %2474 = vmatprep.subr.bf16.mxu1 %v776_v62 }
 0x163   : > { %v1137_v0 = vpop.f32.mrf.mxu0 }
 0x165   : > { %2475 = vmatpush3.bf16.msra.mxu1 %v776_v62  ;;  %v2511_v2 = vpop.f32.mrf.mxu0 }
 0x166   : > { %2476 = vmatprep.subr.bf16.mxu1 %v775_v1  ;;  %v1187_v23 = vpack.c.bf16 %v2511_v2, %v2510_v63  ;;  %v788_v63 = vld [vmem:[#allocation2 + $0x80] sm:$0xff]  ;;  %v791_v2 = vld [vmem:[#allocation2 + $0xb8] sm:$0xff] }
 0x167   : > { %v1140_v3 = vpop.f32.mrf.mxu0 }
 0x168   : > { %v1186_v26 = vpack.c.bf16 %v1140_v3, %v1137_v0 }
 0x169   : > { %2477 = vmatpush3.bf16.msra.mxu1 %v775_v1  ;;  %v2514_v5 = vpop.f32.mrf.mxu0 }
 0x16a   : > { %2478 = vmatprep.subr.bf16.mxu1 %v774_v4 }
 0x16b   : > { %v1153_v6 = vpop.f32.mrf.mxu0 }
 0x16d   : > { %2479 = vmatpush3.bf16.msra.mxu1 %v774_v4  ;;  %v2515_v8 = vpop.f32.mrf.mxu0 }
 0x16e   : > { %2480 = vmatprep.subr.bf16.mxu1 %v773_v7  ;;  %v1189_v19 = vpack.c.bf16 %v2515_v8, %v2514_v5  ;;  %v789_v5 = vld [vmem:[#allocation2 + $0x88] sm:$0xff] }
 0x16f   : > { %v1156_v9 = vpop.f32.mrf.mxu0  ;;  %v794_v8 = vld [vmem:[#allocation2 + $0x8] sm:$0xff] }
 0x170   : > { %v1188_v22 = vpack.c.bf16 %v1156_v9, %v1153_v6 }
 0x171   : > { %2481 = vmatpush3.bf16.msra.mxu1 %v773_v7  ;;  %v2518_v11 = vpop.f32.mrf.mxu0 }
 0x172   : > { %2482 = vmatprep.subr.bf16.mxu1 %v772_v10 }
 0x173   : > { %v1169_v12 = vpop.f32.mrf.mxu0 }
 0x175   : > { %2483 = vmatpush3.bf16.msra.mxu1 %v772_v10  ;;  %v2519_v14 = vpop.f32.mrf.mxu0 }
 0x176   : > { %v1191_v15 = vpack.c.bf16 %v2519_v14, %v2518_v11  ;;  %v792_v11 = vld [vmem:[#allocation2 + $0x60] sm:$0xff]  ;;  %v795_v14 = vld [vmem:[#allocation2 + $0x78] sm:$0xff] }
 0x177   : > { %v1172_v16 = vpop.f32.mrf.mxu0 }
 0x178   : > { %v1190_v18 = vpack.c.bf16 %v1172_v16, %v1169_v12  ;;  %2485 = vmatmul.mubr.bf16.vlgmr.msra.gmra.mxu1 %v2725_v13  ;;  %2520 = vmatprep.subr.bf16.mxu0 %v1191_v15 }
 0x179   : > { %2552 = vmatprep.subr.bf16.mxu1 %v1191_v15  ;;  %2521 = vmatpush3.bf16.msra.mxu0 %v1191_v15 }
 0x17a   : > { %2560 = vmatpush3.bf16.msra.mxu1 %v1191_v15  ;;  %2522 = vmatprep.subr.bf16.mxu0 %v1190_v18 }
 0x17b   : > { %2553 = vmatprep.subr.bf16.mxu1 %v1190_v18  ;;  %2488 = vmatprep.mubr.bf16.mxu1 %v2726_v17  ;;  %v793_v17 = vld [vmem:[#allocation2 + $0xf0] sm:$0xff] }
 0x17d   : > { %2523 = vmatpush3.bf16.msra.mxu0 %v1190_v18 }
 0x17e   : > { %2561 = vmatpush3.bf16.msra.mxu1 %v1190_v18  ;;  %2524 = vmatprep.subr.bf16.mxu0 %v1189_v19 }
 0x17f   : > { %2554 = vmatprep.subr.bf16.mxu1 %v1189_v19 }
 0x180   : > { %2489 = vmatmul.mubr.bf16.gmra.mxu1 %v2727_v20  ;;  %v1195_v20 = vld [vmem:[#allocation2 + $0x40] sm:$0xff] }
 0x181   : > { %2525 = vmatpush3.bf16.msra.mxu0 %v1189_v19  ;;  %2492 = vmatprep.mubr.bf16.mxu1 %v2728_v21 }
 0x182   : > { %2562 = vmatpush3.bf16.msra.mxu1 %v1189_v19  ;;  %2526 = vmatprep.subr.bf16.mxu0 %v1188_v22 }
 0x183   : > { %2555 = vmatprep.subr.bf16.mxu1 %v1188_v22 }
 0x185   : > { %2527 = vmatpush3.bf16.msra.mxu0 %v1188_v22 }
 0x186   : > { %2563 = vmatpush3.bf16.msra.mxu1 %v1188_v22  ;;  %2528 = vmatprep.subr.bf16.mxu0 %v1187_v23  ;;  %v1199_v22 = vld [vmem:[#allocation2 + $0x70] sm:$0xff] }
 0x187   : > { %2556 = vmatprep.subr.bf16.mxu1 %v1187_v23 }
 0x188   : > { %2493 = vmatmul.mubr.bf16.gmra.mxu1 %v2729_v24  ;;  %v1193_v24 = vld [vmem:[#allocation2 + $0x38] sm:$0xff] }
 0x189   : > { %2529 = vmatpush3.bf16.msra.mxu0 %v1187_v23  ;;  %2496 = vmatprep.mubr.bf16.mxu1 %v2730_v25 }
 0x18a   : > { %2564 = vmatpush3.bf16.msra.mxu1 %v1187_v23  ;;  %2530 = vmatprep.subr.bf16.mxu0 %v1186_v26 }
 0x18b   : > { %2557 = vmatprep.subr.bf16.mxu1 %v1186_v26 }
 0x18d   : > { %2531 = vmatpush3.bf16.msra.mxu0 %v1186_v26 }
 0x18e   : > { %2565 = vmatpush3.bf16.msra.mxu1 %v1186_v26  ;;  %2532 = vmatprep.subr.bf16.mxu0 %v1185_v27  ;;  %v1197_v26 = vld [vmem:[#allocation2 + $0xe0] sm:$0xff] }
 0x18f   : > { %2558 = vmatprep.subr.bf16.mxu1 %v1185_v27 }
 0x190   : > { %2497 = vmatmul.mubr.bf16.gmra.mxu1 %v2731_v28 }
 0x191   : > { %2533 = vmatpush3.bf16.msra.mxu0 %v1185_v27  ;;  %2540 = vmatprep.mubr.bf16.mxu1 %v2732_v29 }
 0x192   : > { %2566 = vmatpush3.bf16.msra.mxu1 %v1185_v27  ;;  %2534 = vmatprep.subr.bf16.mxu0 %v1184_v30 }
 0x193   : > { %2559 = vmatprep.subr.bf16.mxu1 %v1184_v30 }
 0x195   : > { %2535 = vmatpush3.bf16.msra.mxu0 %v1184_v30 }
 0x196   : > { %2567 = vmatpush3.bf16.msra.mxu1 %v1184_v30  ;;  %v1196_v30 = vld [vmem:[#allocation2 + $0xc8] sm:$0xff] }
 0x198   : > { %2537 = vmatmul.mubr.bf16.vlgmr.msra.gmra.mxu0 %v2737_v31 }
 0x199   : > { %2541 = vmatmul.mubr.bf16.vlgmr.msra.gmra.mxu1 %v2733_v32  ;;  %v1200_v32 = vld [vmem:[#allocation2 + $0xc0] sm:$0xff] }
 0x19a   : > { %2544 = vmatprep.mubr.bf16.mxu1 %v2734_v33 }
 0x1a1   : > { %2545 = vmatmul.mubr.bf16.gmra.mxu1 %v2735_v34 }
 0x1a2   : > { %2548 = vmatprep.mubr.bf16.mxu1 %v2738_v35 }
 0x1a9   : > { %2549 = vmatmul.mubr.bf16.gmra.mxu1 %v2739_v36  ;;  %v1194_v36 = vld [vmem:[#allocation2 + $0x58] sm:$0xff] }
 0x238   : > { %v2486_v38 = vpop.f32.mrf.mxu1 }
 0x239   : > { %v959_v40 = vadd.f32 %v2486_v38, %v782_v37  ;;  %v1198_v38 = vld [vmem:[#allocation2 + $0x90] sm:$0xff] }
 0x23a   : > { %v894_v41 = vpop.f32.mrf.mxu1 }
 0x23b   : > { %975 = vst [vmem:[#allocation2 + $0xd8] sm:$0xff] %v959_v40  ;;  %v957_v43 = vadd.f32 %v894_v41, %v780_v39 }
 0x23c   : > { %v2487_v44 = vpop.f32.mrf.mxu1 }
 0x23d   : > { %973 = vst [vmem:[#allocation2 + $0xb0] sm:$0xff] %v957_v43  ;;  %v960_v46 = vadd.f32 %v2487_v44, %v783_v42  ;;  %v1203_v43 = vld [vmem:[#allocation2 + $0x10] sm:$0xff] }
 0x23e   : > { %v897_v47 = vpop.f32.mrf.mxu1 }
 0x23f   : > { %976 = vst [vmem:[#allocation2 + $0x18] sm:$0xff] %v960_v46  ;;  %v958_v49 = vadd.f32 %v897_v47, %v781_v45  ;;  %v1201_v47 = vld [vmem:[#allocation2 + $0xa8] sm:$0xff] }
 0x240   : > { %v2490_v50 = vpop.f32.mrf.mxu1 }
 0x241   : > { %974 = vst [vmem:[#allocation2] sm:$0xff] %v958_v49  ;;  %v963_v52 = vadd.f32 %v2490_v50, %v786_v48  ;;  %v1204_v50 = vld [vmem:[#allocation2 + $0x28] sm:$0xff] }
 0x242   : > { %v910_v53 = vpop.f32.mrf.mxu1 }
 0x243   : > { %979 = vst [vmem:[#allocation2 + $0x30] sm:$0xff] %v963_v52  ;;  %v961_v55 = vadd.f32 %v910_v53, %v784_v51  ;;  %v1202_v53 = vld [vmem:[#allocation2 + $0xd0] sm:$0xff] }
 0x244   : > { %v2491_v56 = vpop.f32.mrf.mxu1 }
 0x245   : > { %977 = vst [vmem:[#allocation2 + $0x50] sm:$0xff] %v961_v55  ;;  %v964_v58 = vadd.f32 %v2491_v56, %v787_v54  ;;  %v1207_v56 = vld [vmem:[#allocation2 + $0x20] sm:$0xff] }
 0x246   : > { %v913_v59 = vpop.f32.mrf.mxu1 }
 0x247   : > { %980 = vst [vmem:[#allocation2 + $0x48] sm:$0xff] %v964_v58  ;;  %v962_v61 = vadd.f32 %v913_v59, %v785_v57  ;;  %v1205_v59 = vld [vmem:[#allocation2 + $0xa0] sm:$0xff] }
 0x248   : > { %v2494_v62 = vpop.f32.mrf.mxu1 }
 0x249   : > { %978 = vst [vmem:[#allocation2 + $0x68] sm:$0xff] %v962_v61  ;;  %v967_v0 = vadd.f32 %v2494_v62, %v790_v60  ;;  %v1208_v62 = vld [vmem:[#allocation2 + $0x98] sm:$0xff] }
 0x24a   : > { %v926_v1 = vpop.f32.mrf.mxu1 }
 0x24b   : > { %983 = vst [vmem:[#allocation2 + $0xe8] sm:$0xff] %v967_v0  ;;  %v965_v3 = vadd.f32 %v926_v1, %v788_v63  ;;  %v1206_v1 = vld [vmem:[#allocation2 + $0xf8] sm:$0xff] }
 0x24c   : > { %v2495_v4 = vpop.f32.mrf.mxu1 }
 0x24d   : > { %981 = vst [vmem:[#allocation2 + $0x80] sm:$0xff] %v965_v3  ;;  %v968_v6 = vadd.f32 %v2495_v4, %v791_v2 }
 0x24e   : > { %v929_v7 = vpop.f32.mrf.mxu1 }
 0x24f   : > { %984 = vst [vmem:[#allocation2 + $0xb8] sm:$0xff] %v968_v6  ;;  %v966_v9 = vadd.f32 %v929_v7, %v789_v5 }
 0x250   : > { %v2498_v10 = vpop.f32.mrf.mxu1 }
 0x251   : > { %982 = vst [vmem:[#allocation2 + $0x88] sm:$0xff] %v966_v9  ;;  %v971_v12 = vadd.f32 %v2498_v10, %v794_v8 }
 0x252   : > { %v942_v13 = vpop.f32.mrf.mxu1 }
 0x253   : > { %987 = vst [vmem:[#allocation2 + $0x8] sm:$0xff] %v971_v12  ;;  %v969_v15 = vadd.f32 %v942_v13, %v792_v11 }
 0x254   : > { %v2499_v16 = vpop.f32.mrf.mxu1 }
 0x255   : > { %985 = vst [vmem:[#allocation2 + $0x60] sm:$0xff] %v969_v15  ;;  %v972_v18 = vadd.f32 %v2499_v16, %v795_v14 }
 0x256   : > { %v945_v19 = vpop.f32.mrf.mxu1 }
 0x257   : > { %988 = vst [vmem:[#allocation2 + $0x78] sm:$0xff] %v972_v18  ;;  %v970_v21 = vadd.f32 %v945_v19, %v793_v17 }
 0x258   : > { %v2538_v23 = vpop.f32.mrf.mxu0 }
 0x259   : > { %986 = vst [vmem:[#allocation2 + $0xf0] sm:$0xff] %v970_v21  ;;  %v2542_v25 = vpop.f32.mrf.mxu1  ;;  %v1373_v27 = vadd.f32 %v2538_v23, %v1195_v20 }
 0x25a   : > { %v1377_v28 = vadd.f32 %v2542_v25, %v1199_v22  ;;  %v1308_v29 = vpop.f32.mrf.mxu0 }
 0x25b   : > { %v1324_v31 = vpop.f32.mrf.mxu1  ;;  %1389 = vst [vmem:[#allocation2 + $0x40] sm:$0xff] %v1373_v27  ;;  %v1371_v33 = vadd.f32 %v1308_v29, %v1193_v24 }
 0x25c   : > { %1393 = vst [vmem:[#allocation2 + $0x70] sm:$0xff] %v1377_v28  ;;  %v1375_v34 = vadd.f32 %v1324_v31, %v1197_v26  ;;  %v2539_v35 = vpop.f32.mrf.mxu0 }
 0x25d   : > { %v2543_v37 = vpop.f32.mrf.mxu1  ;;  %1387 = vst [vmem:[#allocation2 + $0x38] sm:$0xff] %v1371_v33  ;;  %v1374_v39 = vadd.f32 %v2539_v35, %v1196_v30 }
 0x25e   : > { %1391 = vst [vmem:[#allocation2 + $0xe0] sm:$0xff] %v1375_v34  ;;  %v1378_v40 = vadd.f32 %v2543_v37, %v1200_v32  ;;  %v1311_v41 = vpop.f32.mrf.mxu0 }
 0x25f   : > { %v1327_v42 = vpop.f32.mrf.mxu1  ;;  %1390 = vst [vmem:[#allocation2 + $0xc8] sm:$0xff] %v1374_v39  ;;  %v1372_v44 = vadd.f32 %v1311_v41, %v1194_v36 }
 0x260   : > { %1394 = vst [vmem:[#allocation2 + $0xc0] sm:$0xff] %v1378_v40  ;;  %v1376_v45 = vadd.f32 %v1327_v42, %v1198_v38 }
 0x261   : > { %v2546_v46 = vpop.f32.mrf.mxu1  ;;  %1388 = vst [vmem:[#allocation2 + $0x58] sm:$0xff] %v1372_v44 }
 0x262   : > { %1392 = vst [vmem:[#allocation2 + $0x90] sm:$0xff] %v1376_v45  ;;  %v1381_v48 = vadd.f32 %v2546_v46, %v1203_v43 }
 0x263   : > { %v1340_v49 = vpop.f32.mrf.mxu1 }
 0x264   : > { %1397 = vst [vmem:[#allocation2 + $0x10] sm:$0xff] %v1381_v48  ;;  %v1379_v51 = vadd.f32 %v1340_v49, %v1201_v47 }
 0x265   : > { %v2547_v52 = vpop.f32.mrf.mxu1 }
 0x266   : > { %1395 = vst [vmem:[#allocation2 + $0xa8] sm:$0xff] %v1379_v51  ;;  %v1382_v54 = vadd.f32 %v2547_v52, %v1204_v50 }
 0x267   : > { %v1343_v55 = vpop.f32.mrf.mxu1 }
 0x268   : > { %1398 = vst [vmem:[#allocation2 + $0x28] sm:$0xff] %v1382_v54  ;;  %v1380_v57 = vadd.f32 %v1343_v55, %v1202_v53 }
 0x269   : > { %v2550_v58 = vpop.f32.mrf.mxu1 }
 0x26a   : > { %1396 = vst [vmem:[#allocation2 + $0xd0] sm:$0xff] %v1380_v57  ;;  %v1385_v60 = vadd.f32 %v2550_v58, %v1207_v56 }
 0x26b   : > { %v1356_v61 = vpop.f32.mrf.mxu1 }
 0x26c   : > { %1401 = vst [vmem:[#allocation2 + $0x20] sm:$0xff] %v1385_v60  ;;  %v1383_v63 = vadd.f32 %v1356_v61, %v1205_v59 }
 0x26d   : > { %v2551_v0 = vpop.f32.mrf.mxu1 }
 0x26e   : > { %1399 = vst [vmem:[#allocation2 + $0xa0] sm:$0xff] %v1383_v63  ;;  %v1386_v2 = vadd.f32 %v2551_v0, %v1208_v62  ;;  %1406 = sbr.rel (%p2383_p8) target bundleno = 897 (0x381), region = 97 }
 0x26f   : > { %v1359_v3 = vpop.f32.mrf.mxu1 }
 0x270   : > { %1402 = vst [vmem:[#allocation2 + $0x98] sm:$0xff] %v1386_v2  ;;  %v1384_v4 = vadd.f32 %v1359_v3, %v1206_v1 }
 0x272   : > { %1400 = vst [vmem:[#allocation2 + $0xf8] sm:$0xff] %v1384_v4 }
 0x273   : > { %v4058_v5 = vlaneseq  ;;  %v2384_v6 = vld.sshfl [vmem:[%s4042_s3] sm:$0x11 pattern:$0x75316420]  ;;  %v3012_v7 = vmov 1966171168  }
 0x274   : > { %v1450_v8 = vunpack.c.l.s4 %v3012_v7  ;;  %v1448_v10 = vcombine.high %v2384_v6, %v2384_v6  ;;  %v1423_v14 = vld [vmem:[#allocation2 + $0x38] sm:$0xff]  ;;  %v1407_v17 = vld [vmem:[#allocation2 + $0xb0] sm:$0xff]  ;;  %v1408_v19 = vld [vmem:[#allocation2] sm:$0xff]  ;;  %s1506_s6 = sld [smem:[#allocation3]]  ;;  %vm1925_vm1 = vcmask 130112   ;;  %vm1932_vm2 = vcmask 195712  }
 0x275   : > { %v3335_v9 = vshrl.u32 %v4058_v5, 7  ;;  %v1424_v18 = vld [vmem:[#allocation2 + $0x58] sm:$0xff]  ;;  %v3346_v22 = vld [vmem:[%s4043_s4] ss:$0 sm:$0xff]  ;;  %v1426_v35 = vld [vmem:[#allocation2 + $0xc8] sm:$0xff]  ;;  %vm1939_vm3 = vcmask 261312  }
 0x276   : > { %v1451_v11 = vunpack.c.0.s8 %v1450_v8  ;;  %v1425_v27 = vld [vmem:[#allocation2 + $0x40] sm:$0xff]  ;;  %v1409_v28 = vld [vmem:[#allocation2 + $0xd8] sm:$0xff]  ;;  %v1411_v42 = vld [vmem:[#allocation2 + $0x50] sm:$0xff]  ;;  %vm1946_vm4 = vcmask 326912   ;;  %vm1953_vm5 = vcmask 392512   ;;  %vm1960_vm6 = vcmask 458112  }
 0x277   : > { %v1465_v13 = vsub.s32 0, %v3335_v9  ;;  %v1410_v36 = vld [vmem:[#allocation2 + $0x18] sm:$0xff]  ;;  %v1427_v41 = vld [vmem:[#allocation2 + $0xe0] sm:$0xff]  ;;  %v1428_v47 = vld [vmem:[#allocation2 + $0x90] sm:$0xff]  ;;  %vm1967_vm7 = vcmask 523712   ;;  %vm1974_vm8 = vcmask 589312  }
 0x278   : > { %v1454_v12 = vsub.s32 %v1451_v11, %v3335_v9  ;;  %v1412_v48 = vld [vmem:[#allocation2 + $0x68] sm:$0xff]  ;;  %v1429_v53 = vld [vmem:[#allocation2 + $0x70] sm:$0xff]  ;;  %v1430_v59 = vld [vmem:[#allocation2 + $0xc0] sm:$0xff]  ;;  %vm1981_vm9 = vcmask 654912   ;;  %vm1988_vm10 = vcmask 720512   ;;  %vm1995_vm11 = vcmask 786112  }
 0x279   : > { %v1413_v54 = vld [vmem:[#allocation2 + $0x30] sm:$0xff]  ;;  %v1414_v60 = vld [vmem:[#allocation2 + $0x48] sm:$0xff]  ;;  %v1415_v2 = vld [vmem:[#allocation2 + $0x80] sm:$0xff]  ;;  %vm2002_vm12 = vcmask 851712   ;;  %vm2009_vm13 = vcmask 917312   ;;  %vm2016_vm14 = vcmask 982912  }
 0x27a   : > { %v1462_v15 = vrot.slane %v1448_v10, %v1454_v12  ;;  %v1455_v16 = vrot.slane %v2384_v6, %v1454_v12  ;;  %v1431_v1 = vld [vmem:[#allocation2 + $0xa8] sm:$0xff]  ;;  %v1432_v8 = vld [vmem:[#allocation2 + $0xd0] sm:$0xff]  ;;  %vm2023_vm15 = vcmask 1048512   ;;  %vm2104_vm0 = vcmask 1041409  }
 0x27b   : > { %v1416_v10 = vld [vmem:[#allocation2 + $0x88] sm:$0xff] }
 0x27c   : > { %v3339_v20 = vrot.slane %v1462_v15, %v1465_v13  ;;  %v3341_v21 = vrot.slane %v1455_v16, %v1465_v13  ;;  %v1433_v15 = vld [vmem:[#allocation2 + $0x10] sm:$0xff]  ;;  %v1417_v16 = vld [vmem:[#allocation2 + $0xe8] sm:$0xff] }
 0x27e   : > { %v3349_v23 = vadd.f32 %v3339_v20, %v1423_v14  ;;  %v3352_v24 = vadd.f32 %v3341_v21, %v1407_v17  ;;  %v3355_v25 = vadd.f32 %v3339_v20, %v1424_v18  ;;  %v3358_v26 = vadd.f32 %v3341_v21, %v1408_v19 }
 0x27f   : > { %v3365_v31 = vadd.f32 %v3339_v20, %v1425_v27  ;;  %v3372_v34 = vadd.f32 %v3341_v21, %v1409_v28  ;;  %v3375_v37 = vadd.f32 %v3339_v20, %v1426_v35  ;;  %v3382_v40 = vadd.f32 %v3341_v21, %v1410_v36  ;;  %v1434_v28 = vld [vmem:[#allocation2 + $0x28] sm:$0xff]  ;;  %v1435_v36 = vld [vmem:[#allocation2 + $0xa0] sm:$0xff] }
 0x280   : > { %v1529_v29 = vmul.f32 %v3346_v22, %v3349_v23  ;;  %v1513_v30 = vmul.f32 %v3346_v22, %v3352_v24  ;;  %v1530_v32 = vmul.f32 %v3346_v22, %v3355_v25  ;;  %v1514_v33 = vmul.f32 %v3346_v22, %v3358_v26 }
 0x281   : > { %v1531_v38 = vmul.f32 %v3346_v22, %v3365_v31  ;;  %v1515_v39 = vmul.f32 %v3346_v22, %v3372_v34  ;;  %v1532_v43 = vmul.f32 %v3346_v22, %v3375_v37  ;;  %v1516_v44 = vmul.f32 %v3346_v22, %v3382_v40 }
 0x282   : > { %1577 = vadd.xlane.f32.xlu1 %v1529_v29  ;;  %1545 = vadd.xlane.f32.xlu0 %v1513_v30  ;;  %v3389_v45 = vadd.f32 %v3339_v20, %v1427_v41  ;;  %v3392_v46 = vadd.f32 %v3341_v21, %v1411_v42  ;;  %v3395_v49 = vadd.f32 %v3339_v20, %v1428_v47  ;;  %v1418_v29 = vld [vmem:[#allocation2 + $0xb8] sm:$0xff]  ;;  %v1420_v47 = vld [vmem:[#allocation2 + $0xf0] sm:$0xff] }
 0x283   : > { %v3402_v52 = vadd.f32 %v3341_v21, %v1412_v48  ;;  %v3405_v55 = vadd.f32 %v3339_v20, %v1429_v53  ;;  %v3412_v58 = vadd.f32 %v3341_v21, %v1413_v54  ;;  %v3415_v61 = vadd.f32 %v3339_v20, %v1430_v59  ;;  %v1437_v54 = vld [vmem:[#allocation2 + $0x20] sm:$0xff] }
 0x284   : > { %v1533_v50 = vmul.f32 %v3346_v22, %v3389_v45  ;;  %v1517_v51 = vmul.f32 %v3346_v22, %v3392_v46  ;;  %v1534_v56 = vmul.f32 %v3346_v22, %v3395_v49  ;;  %v3422_v0 = vadd.f32 %v3341_v21, %v1414_v60 }
 0x285   : > { %v1518_v57 = vmul.f32 %v3346_v22, %v3402_v52  ;;  %v1535_v62 = vmul.f32 %v3346_v22, %v3405_v55  ;;  %v1519_v63 = vmul.f32 %v3346_v22, %v3412_v58  ;;  %v1536_v3 = vmul.f32 %v3346_v22, %v3415_v61 }
 0x286   : > { %1579 = vadd.xlane.f32.xlu1 %v1530_v32  ;;  %1547 = vadd.xlane.f32.xlu0 %v1514_v33  ;;  %v1520_v4 = vmul.f32 %v3346_v22, %v3422_v0  ;;  %v3429_v6 = vadd.f32 %v3339_v20, %v1431_v1  ;;  %v3432_v7 = vadd.f32 %v3341_v21, %v1415_v2  ;;  %v1422_v1 = vld [vmem:[#allocation2 + $0x78] sm:$0xff] }
 0x287   : > { %v3435_v11 = vadd.f32 %v3339_v20, %v1432_v8  ;;  %v3442_v14 = vadd.f32 %v3341_v21, %v1416_v10  ;;  %v3445_v17 = vadd.f32 %v3339_v20, %v1433_v15  ;;  %v3452_v27 = vadd.f32 %v3341_v21, %v1417_v16 }
 0x288   : > { %v1537_v12 = vmul.f32 %v3346_v22, %v3429_v6  ;;  %v1521_v13 = vmul.f32 %v3346_v22, %v3432_v7  ;;  %v3455_v30 = vadd.f32 %v3339_v20, %v1434_v28  ;;  %v3462_v35 = vadd.f32 %v3341_v21, %v1418_v29 }
 0x289   : > { %v1538_v18 = vmul.f32 %v3346_v22, %v3435_v11  ;;  %v1522_v19 = vmul.f32 %v3346_v22, %v3442_v14  ;;  %v1539_v32 = vmul.f32 %v3346_v22, %v3445_v17  ;;  %v1523_v33 = vmul.f32 %v3346_v22, %v3452_v27 }
 0x28a   : > { %1581 = vadd.xlane.f32.xlu1 %v1531_v38  ;;  %1549 = vadd.xlane.f32.xlu0 %v1515_v39  ;;  %v1419_v38 = vld [vmem:[#allocation2 + $0x60] sm:$0xff]  ;;  %v1540_v39 = vmul.f32 %v3346_v22, %v3455_v30  ;;  %v1524_v41 = vmul.f32 %v3346_v22, %v3462_v35  ;;  %v3469_v42 = vadd.f32 %v3339_v20, %v1435_v36 }
 0x28b   : > { %v3482_v53 = vadd.f32 %v3341_v21, %v1420_v47  ;;  %v3502_v8 = vadd.f32 %v3341_v21, %v1422_v1 }
 0x28d   : > { %v1526_v60 = vmul.f32 %v3346_v22, %v3482_v53  ;;  %4083 = vst [vmem:[#allocation28_spill] sm:$0xff] %v3502_v8 }
 0x28e   : > { %1583 = vadd.xlane.f32.xlu1 %v1532_v43  ;;  %1551 = vadd.xlane.f32.xlu0 %v1516_v44  ;;  %v3472_v43 = vadd.f32 %v3341_v21, %v1419_v38  ;;  %v1436_v44 = vld [vmem:[#allocation2 + $0xf8] sm:$0xff] }
 0x28f   : > { %v3475_v48 = vadd.f32 %v3339_v20, %v1436_v44 }
 0x291   : > { %v1542_v59 = vmul.f32 %v3346_v22, %v3475_v48 }
 0x292   : > { %1585 = vadd.xlane.f32.xlu1 %v1533_v50  ;;  %1553 = vadd.xlane.f32.xlu0 %v1517_v51  ;;  %v1541_v50 = vmul.f32 %v3346_v22, %v3469_v42  ;;  %v1525_v51 = vmul.f32 %v3346_v22, %v3472_v43 }
 0x296   : > { %1587 = vadd.xlane.f32.xlu1 %v1534_v56  ;;  %1555 = vadd.xlane.f32.xlu0 %v1518_v57  ;;  %v1421_v56 = vld [vmem:[#allocation2 + $0x8] sm:$0xff]  ;;  %v3485_v57 = vadd.f32 %v3339_v20, %v1437_v54 }
 0x29a   : > { %1589 = vadd.xlane.f32.xlu1 %v1535_v62  ;;  %1557 = vadd.xlane.f32.xlu0 %v1519_v63  ;;  %v3492_v62 = vadd.f32 %v3341_v21, %v1421_v56  ;;  %v1438_v63 = vld [vmem:[#allocation2 + $0x98] sm:$0xff] }
 0x29b   : > { %v3495_v2 = vadd.f32 %v3339_v20, %v1438_v63  ;;  %v1528_v20 = vmul.f32 %v3346_v22, %v3502_v8 }
 0x29d   : > { %4082 = vst [vmem:[#allocation27_spill] sm:$0xff] %v3495_v2  ;;  %v1544_v10 = vmul.f32 %v3346_v22, %v3495_v2 }
 0x29e   : > { %1591 = vadd.xlane.f32.xlu1 %v1536_v3  ;;  %1559 = vadd.xlane.f32.xlu0 %v1520_v4  ;;  %v1543_v3 = vmul.f32 %v3346_v22, %v3485_v57  ;;  %v1527_v4 = vmul.f32 %v3346_v22, %v3492_v62 }
 0x2a2   : > { %1593 = vadd.xlane.f32.xlu1 %v1537_v12  ;;  %1561 = vadd.xlane.f32.xlu0 %v1521_v13  ;;  %v3508_v12 = vstv %s1506_s6 }
 0x2a6   : > { %1595 = vadd.xlane.f32.xlu1 %v1538_v18  ;;  %1563 = vadd.xlane.f32.xlu0 %v1522_v19 }
 0x2aa   : > { %1597 = vadd.xlane.f32.xlu1 %v1539_v32  ;;  %1565 = vadd.xlane.f32.xlu0 %v1523_v33 }
 0x2ae   : > { %1599 = vadd.xlane.f32.xlu1 %v1540_v39  ;;  %1567 = vadd.xlane.f32.xlu0 %v1524_v41 }
 0x2b2   : > { %1601 = vadd.xlane.f32.xlu1 %v1541_v50  ;;  %1569 = vadd.xlane.f32.xlu0 %v1525_v51 }
 0x2b6   : > { %1603 = vadd.xlane.f32.xlu1 %v1542_v59  ;;  %1571 = vadd.xlane.f32.xlu0 %v1526_v60 }
 0x2ba   : > { %1605 = vadd.xlane.f32.xlu1 %v1543_v3  ;;  %1573 = vadd.xlane.f32.xlu0 %v1527_v4 }
 0x2be   : > { %1607 = vadd.xlane.f32.xlu1 %v1544_v10  ;;  %1575 = vadd.xlane.f32.xlu0 %v1528_v20 }
 0x30b   : > { %v1578_v13 = vpop.xlane.xlu1 %1577  ;;  %v1546_v15 = vpop.xlane.xlu0 %1545 }
 0x30c   : > { %v1626_v16 = vadd.f32 %v3508_v12, %v1578_v13  ;;  %v1610_v21 = vadd.f32 %v3508_v12, %v1546_v15 }
 0x30e   : > { %v1642_v18 = vmax.f32 %v1610_v21, %v1626_v16 }
 0x30f   : > { %v1580_v19 = vpop.xlane.xlu1 %1579  ;;  %v1548_v28 = vpop.xlane.xlu0 %1547 }
 0x310   : > { %v1658_v29 = vsub.f32 %v1610_v21, %v1642_v18  ;;  %v1674_v32 = vsub.f32 %v1626_v16, %v1642_v18  ;;  %v1627_v33 = vadd.f32 %v3508_v12, %v1580_v19  ;;  %v1611_v22 = vadd.f32 %v3508_v12, %v1548_v28 }
 0x312   : > { %v1690_v36 = vmul.f32 1.442695, %v1658_v29  ;;  %v1722_v38 = vmul.f32 1.442695, %v1674_v32  ;;  %v1643_v39 = vmax.f32 %v1611_v22, %v1627_v33 }
 0x313   : > { %v1582_v41 = vpop.xlane.xlu1 %1581  ;;  %v1550_v44 = vpop.xlane.xlu0 %1549 }
 0x314   : > { %2740 = vpow2.f32 %v1690_v36  ;;  %v1659_v47 = vsub.f32 %v1611_v22, %v1643_v39  ;;  %v1675_v50 = vsub.f32 %v1627_v33, %v1643_v39  ;;  %v1628_v51 = vadd.f32 %v3508_v12, %v1582_v41 }
 0x315   : > { %2742 = vpow2.f32 %v1722_v38  ;;  %v1612_v54 = vadd.f32 %v3508_v12, %v1550_v44 }
 0x316   : > { %v1692_v56 = vmul.f32 1.442695, %v1659_v47  ;;  %v1724_v59 = vmul.f32 1.442695, %v1675_v50 }
 0x317   : > { %v1644_v60 = vmax.f32 %v1612_v54, %v1628_v51  ;;  %v1584_v63 = vpop.xlane.xlu1 %1583  ;;  %v1552_v1 = vpop.xlane.xlu0 %1551 }
 0x318   : > { %2744 = vpow2.f32 %v1692_v56  ;;  %v1629_v3 = vadd.f32 %v3508_v12, %v1584_v63  ;;  %v1613_v4 = vadd.f32 %v3508_v12, %v1552_v1 }
 0x319   : > { %2746 = vpow2.f32 %v1724_v59  ;;  %v1660_v10 = vsub.f32 %v1612_v54, %v1644_v60  ;;  %v1676_v20 = vsub.f32 %v1628_v51, %v1644_v60 }
 0x31a   : > { %v1645_v13 = vmax.f32 %v1613_v4, %v1629_v3 }
 0x31b   : > { %v1694_v15 = vmul.f32 1.442695, %v1660_v10  ;;  %v1726_v16 = vmul.f32 1.442695, %v1676_v20  ;;  %v1586_v21 = vpop.xlane.xlu1 %1585  ;;  %v1554_v18 = vpop.xlane.xlu0 %1553 }
 0x31c   : > { %v1661_v19 = vsub.f32 %v1613_v4, %v1645_v13  ;;  %v1677_v28 = vsub.f32 %v1629_v3, %v1645_v13  ;;  %v1630_v29 = vadd.f32 %v3508_v12, %v1586_v21  ;;  %v1614_v32 = vadd.f32 %v3508_v12, %v1554_v18 }
 0x31d   : > { %2748 = vpow2.f32 %v1694_v15 }
 0x31e   : > { %2750 = vpow2.f32 %v1726_v16  ;;  %v1696_v33 = vmul.f32 1.442695, %v1661_v19  ;;  %v1728_v22 = vmul.f32 1.442695, %v1677_v28  ;;  %v1646_v36 = vmax.f32 %v1614_v32, %v1630_v29 }
 0x31f   : > { %v1588_v38 = vpop.xlane.xlu1 %1587  ;;  %v1556_v39 = vpop.xlane.xlu0 %1555 }
 0x320   : > { %2752 = vpow2.f32 %v1696_v33  ;;  %v1662_v41 = vsub.f32 %v1614_v32, %v1646_v36  ;;  %v1678_v44 = vsub.f32 %v1630_v29, %v1646_v36  ;;  %v1631_v47 = vadd.f32 %v3508_v12, %v1588_v38 }
 0x321   : > { %v3521_v50 = vpop.eup %2740  ;;  %2754 = vpow2.f32 %v1728_v22  ;;  %v1615_v51 = vadd.f32 %v3508_v12, %v1556_v39 }
 0x322   : > { %v3524_v54 = vpop.eup %2742  ;;  %v1698_v56 = vmul.f32 1.442695, %v1662_v41  ;;  %v1730_v59 = vmul.f32 1.442695, %v1678_v44 }
 0x323   : > { %v1754_v60 = vadd.f32 %v3524_v54, %v3521_v50  ;;  %v1647_v63 = vmax.f32 %v1615_v51, %v1631_v47  ;;  %v1590_v1 = vpop.xlane.xlu1 %1589  ;;  %v1558_v3 = vpop.xlane.xlu0 %1557 }
 0x324   : > { %2756 = vpow2.f32 %v1698_v56  ;;  %v1632_v4 = vadd.f32 %v3508_v12, %v1590_v1  ;;  %v1616_v10 = vadd.f32 %v3508_v12, %v1558_v3 }
 0x325   : > { %v3530_v20 = vpop.eup %2744  ;;  %2758 = vrcp.f32 %v1754_v60  ;;  %v1663_v13 = vsub.f32 %v1615_v51, %v1647_v63  ;;  %v1679_v15 = vsub.f32 %v1631_v47, %v1647_v63 }
 0x326   : > { %v3532_v16 = vpop.eup %2746  ;;  %2760 = vpow2.f32 %v1730_v59  ;;  %v1648_v21 = vmax.f32 %v1616_v10, %v1632_v4 }
 0x327   : > { %v1755_v18 = vadd.f32 %v3532_v16, %v3530_v20  ;;  %v1700_v19 = vmul.f32 1.442695, %v1663_v13  ;;  %v1732_v28 = vmul.f32 1.442695, %v1679_v15  ;;  %v1592_v29 = vpop.xlane.xlu1 %1591  ;;  %v1560_v32 = vpop.xlane.xlu0 %1559 }
 0x328   : > { %v1664_v33 = vsub.f32 %v1616_v10, %v1648_v21  ;;  %v1680_v22 = vsub.f32 %v1632_v4, %v1648_v21  ;;  %v1633_v36 = vadd.f32 %v3508_v12, %v1592_v29  ;;  %v1617_v38 = vadd.f32 %v3508_v12, %v1560_v32 }
 0x329   : > { %2762 = vrcp.f32 %v1755_v18 }
 0x32a   : > { %v3538_v39 = vpop.eup %2748  ;;  %2764 = vpow2.f32 %v1700_v19  ;;  %v1702_v41 = vmul.f32 1.442695, %v1664_v33  ;;  %v1734_v44 = vmul.f32 1.442695, %v1680_v22  ;;  %v1649_v47 = vmax.f32 %v1617_v38, %v1633_v36 }
 0x32b   : > { %v3540_v51 = vpop.eup %2750  ;;  %2766 = vpow2.f32 %v1732_v28  ;;  %v1594_v56 = vpop.xlane.xlu1 %1593 }
 0x32c   : > { %v1562_v59 = vpop.xlane.xlu0 %1561  ;;  %v1756_v60 = vadd.f32 %v3540_v51, %v3538_v39  ;;  %2768 = vpow2.f32 %v1702_v41  ;;  %v1665_v63 = vsub.f32 %v1617_v38, %v1649_v47  ;;  %v1681_v1 = vsub.f32 %v1633_v36, %v1649_v47 }
 0x32d   : > { %v3544_v3 = vpop.eup %2752  ;;  %2770 = vpow2.f32 %v1734_v44  ;;  %v1634_v4 = vadd.f32 %v3508_v12, %v1594_v56  ;;  %v1618_v10 = vadd.f32 %v3508_v12, %v1562_v59 }
 0x32e   : > { %v3548_v13 = vpop.eup %2754  ;;  %2772 = vrcp.f32 %v1756_v60  ;;  %v1704_v15 = vmul.f32 1.442695, %v1665_v63  ;;  %v1736_v21 = vmul.f32 1.442695, %v1681_v1 }
 0x32f   : > { %v1757_v18 = vadd.f32 %v3548_v13, %v3544_v3  ;;  %v1650_v19 = vmax.f32 %v1618_v10, %v1634_v4  ;;  %v1596_v28 = vpop.xlane.xlu1 %1595 }
 0x330   : > { %v1564_v29 = vpop.xlane.xlu0 %1563  ;;  %2774 = vpow2.f32 %v1704_v15  ;;  %v1635_v32 = vadd.f32 %v3508_v12, %v1596_v28 }
 0x331   : > { %v1619_v33 = vadd.f32 %v3508_v12, %v1564_v29  ;;  %v3554_v22 = vpop.eup %2756  ;;  %2776 = vrcp.f32 %v1757_v18  ;;  %v1666_v36 = vsub.f32 %v1618_v10, %v1650_v19  ;;  %v1682_v38 = vsub.f32 %v1634_v4, %v1650_v19 }
 0x332   : > { %v2759_v41 = vpop.eup %2758  ;;  %2778 = vpow2.f32 %v1736_v21 }
 0x333   : > { %v1651_v44 = vmax.f32 %v1619_v33, %v1635_v32  ;;  %v3556_v47 = vpop.eup %2760  ;;  %v3559_v56 = vmul.f32 %v2759_v41, %v3521_v50  ;;  %v3562_v59 = vmul.f32 %v2759_v41, %v3524_v54  ;;  %v1706_v60 = vmul.f32 1.442695, %v1666_v36  ;;  %v1598_v63 = vpop.xlane.xlu1 %1597 }
 0x334   : > { %v1566_v1 = vpop.xlane.xlu0 %1565  ;;  %v1758_v15 = vadd.f32 %v3556_v47, %v3554_v22  ;;  %v1738_v18 = vmul.f32 1.442695, %v1682_v38  ;;  %v1636_v4 = vadd.f32 %v3508_v12, %v1598_v63 }
 0x335   : > { %v1818_v10 = vmul.f32 %v3559_v56, %v3352_v24  ;;  %v1834_v21 = vmul.f32 %v3562_v59, %v3349_v23  ;;  %v1667_v54 = vsub.f32 %v1619_v33, %v1651_v44  ;;  %v1683_v19 = vsub.f32 %v1635_v32, %v1651_v44 }
 0x336   : > { %v2763_v50 = vpop.eup %2762  ;;  %2780 = vrcp.f32 %v1758_v15  ;;  %v1620_v28 = vadd.f32 %v3508_v12, %v1566_v1 }
 0x337   : > { %v3572_v29 = vpop.eup %2764  ;;  %v1850_v36 = vadd.f32 %v1834_v21, %v1818_v10  ;;  %v3575_v38 = vmul.f32 %v2763_v50, %v3530_v20  ;;  %v3578_v41 = vmul.f32 %v2763_v50, %v3532_v16  ;;  %2782 = vpow2.f32 %v1706_v60  ;;  %v1600_v24 = vpop.xlane.xlu1 %1599 }
 0x338   : > { %v1568_v63 = vpop.xlane.xlu0 %1567  ;;  %v3580_v23 = vpop.eup %2766  ;;  %2784 = vpow2.f32 %v1738_v18  ;;  %v1652_v15 = vmax.f32 %v1620_v28, %v1636_v4  ;;  %v1637_v44 = vadd.f32 %v3508_v12, %v1600_v24  ;;  %v1708_v18 = vmul.f32 1.442695, %v1667_v54 }
 0x339   : > { %v3582_v33 = vpop.eup %2768  ;;  %1866 = vst [vmem:[%s3253_s23] sm:$0xff] %v1850_v36  ;;  %v1819_v32 = vmul.f32 %v3575_v38, %v3358_v26  ;;  %v1835_v20 = vmul.f32 %v3578_v41, %v3355_v25  ;;  %v1621_v16 = vadd.f32 %v3508_v12, %v1568_v63  ;;  %v1759_v1 = vadd.f32 %v3580_v23, %v3572_v29 }
 0x33a   : > { %v3591_v60 = vpop.eup %2770  ;;  %v1668_v10 = vsub.f32 %v1620_v28, %v1652_v15  ;;  %v1740_v36 = vmul.f32 1.442695, %v1683_v19  ;;  %v1684_v63 = vsub.f32 %v1636_v4, %v1652_v15 }
 0x33b   : > { %v2773_v21 = vpop.eup %2772  ;;  %v1851_v50 = vadd.f32 %v1835_v20, %v1819_v32  ;;  %v1760_v26 = vadd.f32 %v3591_v60, %v3582_v33  ;;  %2786 = vrcp.f32 %v1759_v1  ;;  %v1602_v5 = vpop.xlane.xlu1 %1601  ;;  %v1653_v54 = vmax.f32 %v1621_v16, %v1637_v44 }
 0x33c   : > { %v3598_v25 = vmul.f32 %v2773_v21, %v3538_v39  ;;  %v3601_v24 = vmul.f32 %v2773_v21, %v3540_v51  ;;  %v1570_v2 = vpop.xlane.xlu0 %1569  ;;  %v1710_v51 = vmul.f32 1.442695, %v1668_v10  ;;  %v1638_v10 = vadd.f32 %v3508_v12, %v1602_v5 }
 0x33d   : > { %v3603_v8 = vpop.eup %2774  ;;  %1867 = vst [vmem:[%s3253_s23 + $0x8] sm:$0xff] %v1851_v50  ;;  %2788 = vrcp.f32 %v1760_v26  ;;  %v1669_v20 = vsub.f32 %v1621_v16, %v1653_v54  ;;  %v1622_v16 = vadd.f32 %v3508_v12, %v1570_v2 }
 0x33e   : > { %v2777_v28 = vpop.eup %2776  ;;  %v1820_v19 = vmul.f32 %v3598_v25, %v3372_v34  ;;  %v1836_v39 = vmul.f32 %v3601_v24, %v3365_v31  ;;  %2790 = vpow2.f32 %v1708_v18  ;;  %v1742_v34 = vmul.f32 1.442695, %v1684_v63 }
 0x33f   : > { %v3610_v32 = vpop.eup %2778  ;;  %v3613_v4 = vmul.f32 %v2777_v28, %v3544_v3  ;;  %v3616_v15 = vmul.f32 %v2777_v28, %v3548_v13  ;;  %2792 = vpow2.f32 %v1740_v36  ;;  %v1685_v3 = vsub.f32 %v1637_v44, %v1653_v54  ;;  %v1604_v50 = vpop.xlane.xlu1 %1603 }
 0x340   : > { %v1852_v1 = vadd.f32 %v1836_v39, %v1820_v19  ;;  %v1761_v21 = vadd.f32 %v3610_v32, %v3603_v8  ;;  %v1712_v13 = vmul.f32 1.442695, %v1669_v20  ;;  %v1572_v26 = vpop.xlane.xlu0 %1571  ;;  %v1654_v2 = vmax.f32 %v1622_v16, %v1638_v10 }
 0x341   : > { %v1821_v31 = vmul.f32 %v3613_v4, %v3382_v40  ;;  %v1837_v18 = vmul.f32 %v3616_v15, %v3375_v37  ;;  %v1744_v5 = vmul.f32 1.442695, %v1685_v3  ;;  %v1639_v44 = vadd.f32 %v3508_v12, %v1604_v50 }
 0x342   : > { %1868 = vst [vmem:[%s3253_s23 + $0x10] sm:$0xff] %v1852_v1  ;;  %2794 = vrcp.f32 %v1761_v21  ;;  %v1623_v54 = vadd.f32 %v3508_v12, %v1572_v26  ;;  %v1686_v20 = vsub.f32 %v1638_v10, %v1654_v2 }
 0x343   : > { %v2781_v36 = vpop.eup %2780  ;;  %v1853_v28 = vadd.f32 %v1837_v18, %v1821_v31  ;;  %2796 = vpow2.f32 %v1710_v51  ;;  %v1670_v51 = vsub.f32 %v1622_v16, %v1654_v2 }
 0x344   : > { %v3627_v63 = vpop.eup %2782  ;;  %v3630_v40 = vmul.f32 %v2781_v36, %v3554_v22  ;;  %v3633_v37 = vmul.f32 %v2781_v36, %v3556_v47  ;;  %2798 = vpow2.f32 %v1742_v34  ;;  %v1655_v21 = vmax.f32 %v1623_v54, %v1639_v44  ;;  %v1606_v34 = vpop.xlane.xlu1 %1605 }
 0x345   : > { %v3635_v19 = vpop.eup %2784  ;;  %1869 = vst [vmem:[%s3253_s23 + $0x18] sm:$0xff] %v1853_v28  ;;  %2800 = vpow2.f32 %v1712_v13  ;;  %v1714_v18 = vmul.f32 1.442695, %v1670_v51  ;;  %v1574_v3 = vpop.xlane.xlu0 %1573  ;;  %v1746_v26 = vmul.f32 1.442695, %v1686_v20  ;;  %v1640_v36 = vadd.f32 %v3508_v12, %v1606_v34 }
 0x346   : > { %v1822_v39 = vmul.f32 %v3630_v40, %v3392_v46  ;;  %v1838_v22 = vmul.f32 %v3633_v37, %v3389_v45  ;;  %v1762_v47 = vadd.f32 %v3635_v19, %v3627_v63  ;;  %2802 = vpow2.f32 %v1744_v5 }
 0x347   : > { %v1671_v5 = vsub.f32 %v1623_v54, %v1655_v21  ;;  %v1687_v2 = vsub.f32 %v1639_v44, %v1655_v21 }
 0x348   : > { %v1854_v1 = vadd.f32 %v1838_v22, %v1822_v39  ;;  %v2787_v31 = vpop.eup %2786  ;;  %2804 = vrcp.f32 %v1762_v47  ;;  %v1624_v39 = vadd.f32 %v3508_v12, %v1574_v3 }
 0x349   : > { %v3648_v46 = vmul.f32 %v2787_v31, %v3572_v29  ;;  %v3651_v45 = vmul.f32 %v2787_v31, %v3580_v23  ;;  %2806 = vpow2.f32 %v1714_v18  ;;  %v1576_v54 = vpop.xlane.xlu0 %1575  ;;  %v1716_v20 = vmul.f32 1.442695, %v1671_v5 }
 0x34a   : > { %v2789_v13 = vpop.eup %2788  ;;  %1870 = vst [vmem:[%s3253_s23 + $0x20] sm:$0xff] %v1854_v1  ;;  %2808 = vpow2.f32 %v1746_v26  ;;  %v1748_v21 = vmul.f32 1.442695, %v1687_v2  ;;  %v1656_v34 = vmax.f32 %v1624_v39, %v1640_v36 }
 0x34b   : > { %v3653_v50 = vpop.eup %2790  ;;  %v3656_v16 = vmul.f32 %v2789_v13, %v3582_v33  ;;  %v3659_v10 = vmul.f32 %v2789_v13, %v3591_v60  ;;  %v1823_v29 = vmul.f32 %v3648_v46, %v3402_v52  ;;  %v1839_v23 = vmul.f32 %v3651_v45, %v3395_v49  ;;  %v1608_v49 = vpop.xlane.xlu1 %1607 }
 0x34c   : > { %v3662_v28 = vpop.eup %2792  ;;  %v1641_v3 = vadd.f32 %v3508_v12, %v1608_v49  ;;  %v1672_v26 = vsub.f32 %v1624_v39, %v1656_v34 }
 0x34d   : > { %v1824_v33 = vmul.f32 %v3656_v16, %v3412_v58  ;;  %v1840_v60 = vmul.f32 %v3659_v10, %v3405_v55  ;;  %v1855_v22 = vadd.f32 %v1839_v23, %v1823_v29  ;;  %v1763_v52 = vadd.f32 %v3662_v28, %v3653_v50 }
 0x34e   : > { %v1688_v29 = vsub.f32 %v1640_v36, %v1656_v34  ;;  %v1718_v2 = vmul.f32 1.442695, %v1672_v26  ;;  %v4084_v36 = vlaneseq }
 0x34f   : > { %v2795_v47 = vpop.eup %2794  ;;  %v1856_v51 = vadd.f32 %v1840_v60, %v1824_v33  ;;  %1871 = vst [vmem:[%s3253_s23 + $0x28] sm:$0xff] %v1855_v22  ;;  %2810 = vrcp.f32 %v1763_v52 }
 0x350   : > { %v3675_v44 = vpop.eup %2796  ;;  %v3679_v58 = vmul.f32 %v2795_v47, %v3603_v8  ;;  %v3682_v55 = vmul.f32 %v2795_v47, %v3610_v32  ;;  %v1625_v32 = vadd.f32 %v3508_v12, %v1576_v54  ;;  %2812 = vpow2.f32 %v1716_v20 }
 0x351   : > { %v3684_v1 = vpop.eup %2798  ;;  %1872 = vst [vmem:[%s3253_s23 + $0x30] sm:$0xff] %v1856_v51  ;;  %2814 = vpow2.f32 %v1748_v21  ;;  %v1750_v33 = vmul.f32 1.442695, %v1688_v29  ;;  %v3709_v39 = vand.u32 127, %v4084_v36 }
 0x352   : > { %v3687_v31 = vpop.eup %2800  ;;  %v1825_v18 = vmul.f32 %v3679_v58, %v3422_v0  ;;  %v1841_v8 = vmul.f32 %v3682_v55, %v3415_v61  ;;  %v1764_v13 = vadd.f32 %v3684_v1, %v3675_v44  ;;  %v1657_v60 = vmax.f32 %v1625_v32, %v1641_v3 }
 0x353   : > { %v3697_v23 = vpop.eup %2802  ;;  %v1927_v21 = vadd.s32 4294967280, %v3709_v39 }
 0x354   : > { %v1857_v5 = vadd.f32 %v1841_v8, %v1825_v18  ;;  %2816 = vrcp.f32 %v1764_v13  ;;  %v1765_v0 = vadd.f32 %v3697_v23, %v3687_v31  ;;  %v1673_v52 = vsub.f32 %v1625_v32, %v1657_v60 }
 0x355   : > { %v2805_v61 = vpop.eup %2804  ;;  %v1689_v47 = vsub.f32 %v1641_v3, %v1657_v60  ;;  %v1941_v13 = vadd.s32 4294967264, %v3709_v39 }
 0x356   : > { %1873 = vst [vmem:[%s3253_s23 + $0x38] sm:$0xff] %v1857_v5  ;;  %v3703_v12 = vmul.f32 %v2805_v61, %v3627_v63  ;;  %v3706_v22 = vmul.f32 %v2805_v61, %v3635_v19  ;;  %2818 = vrcp.f32 %v1765_v0  ;;  %v3715_v54 = vpop.eup %2806  ;;  %v1920_v63 = vadd.s32 4294967288, %v3709_v39 }
 0x357   : > { %2820 = vpow2.f32 %v1718_v2  ;;  %v1720_v19 = vmul.f32 1.442695, %v1673_v52  ;;  %v1752_v20 = vmul.f32 1.442695, %v1689_v47  ;;  %v3719_v18 = vpop.eup %2808  ;;  %v3740_v5 = vsub.s32 %v1927_v21, %v3335_v9 }
 0x358   : > { %v1826_v51 = vmul.f32 %v3703_v12, %v3432_v7  ;;  %v1842_v49 = vmul.f32 %v3706_v22, %v3429_v6  ;;  %2822 = vpow2.f32 %v1750_v33  ;;  %v3723_v7 = vsub.s32 %v3709_v39, %v3335_v9 }
 0x359   : > { %2824 = vpow2.f32 %v1720_v19  ;;  %v1934_v6 = vadd.s32 4294967272, %v3709_v39  ;;  %v1766_v3 = vadd.f32 %v3719_v18, %v3715_v54  ;;  %v3730_v32 = vsub.s32 %v1920_v63, %v3335_v9 }
 0x35a   : > { %v1858_v34 = vadd.f32 %v1842_v49, %v1826_v51  ;;  %2826 = vpow2.f32 %v1752_v20  ;;  %v1948_v0 = vadd.s32 4294967256, %v3709_v39  ;;  %v1955_v2 = vadd.s32 4294967248, %v3709_v39 }
 0x35b   : > { %2828 = vrcp.f32 %v1766_v3  ;;  %v1962_v33 = vadd.s32 4294967240, %v3709_v39  ;;  %v3755_v52 = vsub.s32 %v1934_v6, %v3335_v9  ;;  %v1976_v47 = vadd.s32 4294967224, %v3709_v39 }
 0x35c   : > { %v2811_v8 = vpop.eup %2810  ;;  %1874 = vst [vmem:[%s3253_s23 + $0x40] sm:$0xff] %v1858_v34  ;;  %v1983_v51 = vadd.s32 4294967216, %v3709_v39  ;;  %v3760_v63 = vsub.s32 %v1941_v13, %v3335_v9  ;;  %v3766_v20 = vsub.s32 %v1948_v0, %v3335_v9  ;;  %v3775_v6 = vsub.s32 %v1955_v2, %v3335_v9 }
 0x35d   : > { %v3734_v26 = vmul.f32 %v2811_v8, %v3653_v50  ;;  %v3737_v29 = vmul.f32 %v2811_v8, %v3662_v28  ;;  %v3744_v61 = vpop.eup %2812  ;;  %v1969_v50 = vadd.s32 4294967232, %v3709_v39  ;;  %v3778_v3 = vsub.s32 %v1962_v33, %v3335_v9 }
 0x35e   : > { %v3752_v36 = vpop.eup %2814  ;;  %v3785_v0 = vsub.s32 %v1976_v47, %v3335_v9 }
 0x35f   : > { %v1827_v28 = vmul.f32 %v3734_v26, %v3442_v14  ;;  %v1843_v60 = vmul.f32 %v3737_v29, %v3435_v11  ;;  %v1990_v14 = vadd.s32 4294967208, %v3709_v39  ;;  %v1767_v11 = vadd.f32 %v3752_v36, %v3744_v61 }
 0x360   : > { %v3781_v13 = vsub.s32 %v1969_v50, %v3335_v9  ;;  %v1924_v50 = vrot.slane %v3575_v38, %v3730_v32  ;;  %v1931_v38 = vrot.slane %v3598_v25, %v3740_v5  ;;  %v1997_v25 = vadd.s32 4294967200, %v3709_v39 }
 0x361   : > { %v2817_v49 = vpop.eup %2816  ;;  %v1859_v19 = vadd.f32 %v1843_v60, %v1827_v28  ;;  %2830 = vrcp.f32 %v1767_v11  ;;  %v3799_v28 = vsub.s32 %v1990_v14, %v3335_v9 }
 0x362   : > { %v3769_v21 = vmul.f32 %v2817_v49, %v3675_v44  ;;  %v3772_v34 = vmul.f32 %v2817_v49, %v3684_v1  ;;  %v3788_v44 = vsub.s32 %v1983_v51, %v3335_v9 }
 0x363   : > { %v2819_v8 = vpop.eup %2818  ;;  %1875 = vst [vmem:[%s3253_s23 + $0x48] sm:$0xff] %v1859_v19 }
 0x364   : > { %v1828_v1 = vmul.f32 %v3769_v21, %v3452_v27  ;;  %v1844_v2 = vmul.f32 %v3772_v34, %v3445_v17  ;;  %v3794_v33 = vpop.eup %2820  ;;  %v3802_v60 = vmul.f32 %v2819_v8, %v3687_v31  ;;  %v3805_v47 = vmul.f32 %v2819_v8, %v3697_v23 }
 0x365   : > { %v3807_v51 = vpop.eup %2822  ;;  %v1919_v17 = vrot.slane %v3559_v56, %v3723_v7  ;;  %v2032_v27 = vrot.slane %v3578_v41, %v3730_v32  ;;  %v2037_v31 = vrot.slane %v3601_v24, %v3740_v5  ;;  %v1938_v23 = vrot.slane %v3613_v4, %v3755_v52 }
 0x366   : > { %v1860_v49 = vadd.f32 %v1844_v2, %v1828_v1  ;;  %v1829_v19 = vmul.f32 %v3802_v60, %v3462_v35  ;;  %v1845_v56 = vmul.f32 %v3805_v47, %v3455_v30  ;;  %v3823_v14 = vpop.eup %2824  ;;  %v2028_v41 = vrot.slane %v3562_v59, %v3723_v7 }
 0x367   : > { %v2004_v24 = vadd.s32 4294967192, %v3709_v39  ;;  %v1768_v4 = vadd.f32 %v3807_v51, %v3794_v33  ;;  %v3832_v32 = vpop.eup %2826  ;;  %v1926_v35 = vsel %vm1925_vm1, %v1924_v50, %v1919_v17  ;;  %v2042_v30 = vrot.slane %v3616_v15, %v3755_v52 }
 0x368   : > { %1876 = vst [vmem:[%s3253_s23 + $0x50] sm:$0xff] %v1860_v49  ;;  %v1945_v5 = vrot.slane %v3630_v40, %v3760_v63  ;;  %v1861_v59 = vadd.f32 %v1845_v56, %v1829_v19  ;;  %v2033_v7 = vsel %vm1925_vm1, %v2032_v27, %v2028_v41  ;;  %v1933_v11 = vsel %vm1932_vm2, %v1931_v38, %v1926_v35  ;;  %v2829_v1 = vpop.eup %2828 }
 0x369   : > { %2832 = vrcp.f32 %v1768_v4  ;;  %v1769_v8 = vadd.f32 %v3832_v32, %v3823_v14  ;;  %v2038_v2 = vsel %vm1932_vm2, %v2037_v31, %v2033_v7  ;;  %v1940_v50 = vsel %vm1939_vm3, %v1938_v23, %v1933_v11 }
 0x36a   : > { %v2047_v15 = vrot.slane %v3633_v37, %v3760_v63  ;;  %v1952_v40 = vrot.slane %v3648_v46, %v3766_v20  ;;  %1877 = vst [vmem:[%s3253_s23 + $0x58] sm:$0xff] %v1861_v59  ;;  %v2052_v52 = vrot.slane %v3651_v45, %v3766_v20  ;;  %v3853_v17 = vmul.f32 %v2829_v1, %v3715_v54 }
 0x36b   : > { %v3856_v27 = vmul.f32 %v2829_v1, %v3719_v18  ;;  %2834 = vrcp.f32 %v1769_v8  ;;  %v2043_v38 = vsel %vm1939_vm3, %v2042_v30, %v2038_v2  ;;  %v1947_v37 = vsel %vm1946_vm4, %v1945_v5, %v1940_v50 }
 0x36c   : > { %v1959_v46 = vrot.slane %v3656_v16, %v3775_v6  ;;  %v3863_v63 = vsub.s32 %v1997_v25, %v3335_v9  ;;  %v2057_v45 = vrot.slane %v3659_v10, %v3775_v6  ;;  %v1966_v54 = vrot.slane %v3679_v58, %v3778_v3 }
 0x36d   : > { %v1830_v18 = vmul.f32 %v3853_v17, %v3472_v43  ;;  %v1846_v20 = vmul.f32 %v3856_v27, %v3469_v42  ;;  %v2048_v49 = vsel %vm1946_vm4, %v2047_v15, %v2043_v38  ;;  %v1954_v16 = vsel %vm1953_vm5, %v1952_v40, %v1947_v37 }
 0x36e   : > { %v2007_v31 = vsub.s32 %v2004_v24, %v3335_v9  ;;  %v2011_v23 = vadd.s32 4294967184, %v3709_v39  ;;  %v2831_v10 = vpop.eup %2830  ;;  %v2053_v6 = vsel %vm1953_vm5, %v2052_v52, %v2048_v49  ;;  %v2062_v58 = vrot.slane %v3682_v55, %v3778_v3 }
 0x36f   : > { %v1973_v43 = vrot.slane %v3703_v12, %v3781_v13  ;;  %v1862_v42 = vadd.f32 %v1846_v20, %v1830_v18  ;;  %v1961_v19 = vsel %vm1960_vm6, %v1959_v46, %v1954_v16  ;;  %v2067_v56 = vrot.slane %v3706_v22, %v3781_v13  ;;  %v4085_v46 = vld [vmem:[#allocation28_spill] sm:$0xff] }
 0x370   : > { %v1799_v41 = vmul.f32 %v2831_v10, %v3744_v61  ;;  %v1815_v25 = vmul.f32 %v2831_v10, %v3752_v36  ;;  %v2058_v24 = vsel %vm1960_vm6, %v2057_v45, %v2053_v6  ;;  %v1968_v4 = vsel %vm1967_vm7, %v1966_v54, %v1961_v19 }
 0x371   : > { %v1980_v55 = vrot.slane %v3734_v26, %v3785_v0  ;;  %v2072_v12 = vrot.slane %v3737_v29, %v3785_v0  ;;  %1878 = vst [vmem:[%s3253_s23 + $0x60] sm:$0xff] %v1862_v42  ;;  %v1987_v3 = vrot.slane %v3769_v21, %v3788_v44  ;;  %v2077_v22 = vrot.slane %v3772_v34, %v3788_v44 }
 0x372   : > { %v1831_v61 = vmul.f32 %v1799_v41, %v3482_v53  ;;  %v1847_v36 = vmul.f32 %v1815_v25, %v3475_v48  ;;  %v2063_v13 = vsel %vm1967_vm7, %v2062_v58, %v2058_v24  ;;  %v1975_v35 = vsel %vm1974_vm8, %v1973_v43, %v1968_v4 }
 0x373   : > { %v2018_v26 = vadd.s32 4294967176, %v3709_v39  ;;  %v2068_v29 = vsel %vm1974_vm8, %v2067_v56, %v2063_v13  ;;  %v1994_v21 = vrot.slane %v3802_v60, %v3799_v28  ;;  %v2082_v34 = vrot.slane %v3805_v47, %v3799_v28 }
 0x374   : > { %v1863_v0 = vadd.f32 %v1847_v36, %v1831_v61  ;;  %v1982_v53 = vsel %vm1981_vm9, %v1980_v55, %v1975_v35  ;;  %v2073_v48 = vsel %vm1981_vm9, %v2072_v12, %v2068_v29  ;;  %v2014_v44 = vsub.s32 %v2011_v23, %v3335_v9 }
 0x375   : > { %v1989_v5 = vsel %vm1988_vm10, %v1987_v3, %v1982_v53  ;;  %v2078_v39 = vsel %vm1988_vm10, %v2077_v22, %v2073_v48  ;;  %v2001_v59 = vrot.slane %v3853_v17, %v3863_v63  ;;  %v2087_v60 = vrot.slane %v3856_v27, %v3863_v63  ;;  %v4086_v63 = vld [vmem:[#allocation27_spill] sm:$0xff] }
 0x376   : > { %v2833_v30 = vpop.eup %2832  ;;  %1879 = vst [vmem:[%s3253_s23 + $0x68] sm:$0xff] %v1863_v0  ;;  %v2008_v28 = vrot.slane %v1799_v41, %v2007_v31  ;;  %v2092_v47 = vrot.slane %v1815_v25, %v2007_v31  ;;  %v1996_v1 = vsel %vm1995_vm11, %v1994_v21, %v1989_v5  ;;  %v2083_v2 = vsel %vm1995_vm11, %v2082_v34, %v2078_v39 }
 0x377   : > { %v1800_v7 = vmul.f32 %v2833_v30, %v3794_v33  ;;  %v1816_v11 = vmul.f32 %v2833_v30, %v3807_v51  ;;  %v2021_v50 = vsub.s32 %v2018_v26, %v3335_v9  ;;  %v2003_v27 = vsel %vm2002_vm12, %v2001_v59, %v1996_v1 }
 0x378   : > { %v2835_v8 = vpop.eup %2834  ;;  %v2088_v33 = vsel %vm2002_vm12, %v2087_v60, %v2083_v2  ;;  %v2010_v37 = vsel %vm2009_vm13, %v2008_v28, %v2003_v27 }
 0x379   : > { %v1832_v15 = vmul.f32 %v1800_v7, %v3492_v62  ;;  %v1848_v40 = vmul.f32 %v1816_v11, %v3485_v57  ;;  %v2015_v52 = vrot.slane %v1800_v7, %v2014_v44  ;;  %v2097_v17 = vrot.slane %v1816_v11, %v2014_v44 }
 0x37a   : > { %v1801_v51 = vmul.f32 %v2835_v8, %v3823_v14  ;;  %v1817_v38 = vmul.f32 %v2835_v8, %v3832_v32  ;;  %v2093_v9 = vsel %vm2009_vm13, %v2092_v47, %v2088_v33 }
 0x37b   : > { %v1864_v62 = vadd.f32 %v1848_v40, %v1832_v15  ;;  %v2017_v20 = vsel %vm2016_vm14, %v2015_v52, %v2010_v37  ;;  %v2098_v14 = vsel %vm2016_vm14, %v2097_v17, %v2093_v9 }
 0x37c   : > { %v1833_v57 = vmul.f32 %v1801_v51, %v4085_v46  ;;  %v1849_v45 = vmul.f32 %v1817_v38, %v4086_v63  ;;  %v2022_v54 = vrot.slane %v1801_v51, %v2021_v50  ;;  %v2102_v18 = vrot.slane %v1817_v38, %v2021_v50 }
 0x37d   : > { %1880 = vst [vmem:[%s3253_s23 + $0x70] sm:$0xff] %v1864_v62 }
 0x37e   : > { %v1865_v32 = vadd.f32 %v1849_v45, %v1833_v57  ;;  %v2024_v49 = vsel %vm2023_vm15, %v2022_v54, %v2017_v20  ;;  %v2103_v16 = vsel %vm2023_vm15, %v2102_v18, %v2098_v14 }
 0x37f   : > { %v2105_v31 = vsel %vm2104_vm0, %v2103_v16, %v2024_v49 }
 0x380   : > { %1881 = vst [vmem:[%s3253_s23 + $0x78] sm:$0xff] %v1865_v32  ;;  %2107 = vst [vmem:[%s3255_s13] sm:$0x3] %v2105_v31 }
 0x381 PF: > { %s2395_s19 = sshll.u32 %s2990_s11, 11  ;;  %s4088_s29 = sld [smem:[#allocation30_spill]] }
 0x382   : > { %s2127_s17 = sshll.u32 %s3253_s23, 4  ;;  %s2109_s15 = scalar_lea.sflag [#allocation6], %s3247_s18  ;;  %s3947_s17 = int_to_ptr.vmem [resolvable:$true] %s2127_s17 }
 0x383   : > { %s2836_s26 = scalar_lea.vmem %s3947_s17, 2048  ;;  %s3013_s28 = smov [#allocation8]  }
 0x384   : > { %p2837_p11 = scmp.ne.s32.totalorder %s3947_s17, %s2836_s26  ;;  %s2840_s0 = sshll.u32 %s3013_s28, 4  ;;  %s2841_s0 = int_to_ptr.vmem [resolvable:$false] %s2840_s0 }
 0x385   : > { %s2842_s16 = scalar_lea.vmem %s2841_s0, 4096  ;;  %p2843_p0 = scmp.lt.s32.totalorder %s3947_s17, %s2841_s0 }
 0x386   : > { %p2838_p12 = pnand %p2837_p11, %p3180_p5  ;;  %p2844_p1 = scmp.lt.s32.totalorder %s2842_s16, %s2836_s26 }
 0x387   : > { %s4089_s22 = smov %s4088_s29  ;;  %s3944_s25 = scalar_lea.hbm %s4088_s29, %s2395_s19 }
 0x388   : > { %p2839_p13 = pneg %p2838_p12  ;;  %p2845_p4 = por %p2844_p1, %p2843_p0 }
 0x38a   : > { %p2846_p6 = pnand %p2845_p4, %p2839_p13 }
 0x38c   : > { %2849 = shalt.err (!%p2846_p6)
}
 0x38d   : > { %s2850_s23 = scalar_lea.hbm %s3944_s25, 2048  ;;  %s2854_s8 = scalar_lea.hbm %s4089_s22, 4096 }
 0x38e   : > { %p2851_p3 = scmp.ne.s32.totalorder %s3944_s25, %s2850_s23  ;;  %p2855_p10 = scmp.lt.s32.totalorder %s3944_s25, %s4089_s22 }
 0x38f   : > { %p2856_p8 = scmp.lt.s32.totalorder %s2854_s8, %s2850_s23 }
 0x390   : > { %p2852_p7 = pnand %p2851_p3, %p3180_p5 }
 0x391   : > { %p2857_p11 = por %p2856_p8, %p2855_p10 }
 0x392   : > { %p2853_p9 = pneg %p2852_p7 }
 0x394   : > { %p2858_p12 = pnand %p2857_p11, %p2853_p9 }
 0x396   : > { %2861 = shalt.err (!%p2858_p12)
}
 0x397   : > { %s3014_s24 = smov 128   ;;  %s3015_s20 = smov 8  }
 0x398   : > { %2577 = dma.vmem_to_hbm [thread:$0]  (%p3180_p5), %s3947_s17, 2048, %s3944_s25, %s2109_s15, %s3014_s24, %s3014_s24, %s3015_s20  }
 0x399   : > { %s2390_s29 = sshll.u32 %s2990_s11, 5  ;;  %s2143_s26 = sshll.u32 %s3255_s13, 4  ;;  %s2144_s26 = int_to_ptr.vmem [resolvable:$true] %s2143_s26 }
 0x39a   : > { %s4090_s16 = sld [smem:[#allocation31_spill]]  ;;  %s2114_s21 = scalar_lea.sflag [#allocation10], %s3247_s18 }
 0x39b   : > { %s2862_s10 = scalar_lea.vmem %s2144_s26, 32  ;;  %s3016_s8 = smov [#allocation9]  }
 0x39c   : > { %p2863_p13 = scmp.ne.s32.totalorder %s2144_s26, %s2862_s10  ;;  %s2866_s6 = sshll.u32 %s3016_s8, 4  ;;  %s2867_s6 = int_to_ptr.vmem [resolvable:$false] %s2866_s6 }
 0x39d   : > { %s2868_s19 = scalar_lea.vmem %s2867_s6, 64  ;;  %p2869_p4 = scmp.lt.s32.totalorder %s2144_s26, %s2867_s6 }
 0x39e   : > { %p2864_p0 = pnand %p2863_p13, %p3180_p5  ;;  %p2870_p6 = scmp.lt.s32.totalorder %s2868_s19, %s2862_s10 }
 0x3a0   : > { %s2141_s23 = scalar_lea.hbm %s4090_s16, %s2390_s29  ;;  %p2865_p1 = pneg %p2864_p0 }
 0x3a1   : > { %p2871_p3 = por %p2870_p6, %p2869_p4 }
 0x3a3   : > { %p2872_p7 = pnand %p2871_p3, %p2865_p1 }
 0x3a5   : > { %2875 = shalt.err (!%p2872_p7)
}
 0x3a6   : > { %s2876_s11 = scalar_lea.hbm %s2141_s23, 32  ;;  %s2880_s25 = scalar_lea.hbm %s4090_s16, 64 }
 0x3a7   : > { %p2877_p9 = scmp.ne.s32.totalorder %s2141_s23, %s2876_s11  ;;  %p2881_p11 = scmp.lt.s32.totalorder %s2141_s23, %s4090_s16 }
 0x3a8   : > { %p2882_p12 = scmp.lt.s32.totalorder %s2880_s25, %s2876_s11 }
 0x3a9   : > { %p2878_p10 = pnand %p2877_p9, %p3180_p5 }
 0x3aa   : > { %p2883_p13 = por %p2882_p12, %p2881_p11 }
 0x3ab   : > { %p2879_p8 = pneg %p2878_p10 }
 0x3ad   : > { %p2884_p0 = pnand %p2883_p13, %p2879_p8 }
 0x3af   : > { %2887 = shalt.err (!%p2884_p0)
}
 0x3b0   : > { %2578 = dma.vmem_to_hbm [thread:$0]  (%p3180_p5), %s2144_s26, 32, %s2141_s23, %s2114_s21  }
 0x3b1 PF: > { %s4091_s24 = sld [smem:[#allocation17_spill]]  ;;  %p2588_p1 = scmp.ge.s32.totalorder %s3002_s14, 2 }
 0x3b3   : > { %p2582_p4 = pnand %p2588_p1, %p3184_p2 }
 0x3b5   : > { %p2583_p6 = pneg %p2582_p4 }
 0x3b7   : > { %s2155_s29 = sand.u32 1, %s4091_s24  }
 0x3b8   : > { %s2156_s28 = scalar_lea.sflag [#allocation6], %s2155_s29 }
 0x3b9   : > { %2945 = dma.done.wait (%p2583_p6), %s2156_s28, 2048  }
 0x3ba   : > { %2947 = vsyncadd (%p2583_p6), %s2156_s28, 4294965248  ;;  %s2165_s0 = scalar_lea.sflag [#allocation10], %s2155_s29 }
 0x3bb   : > { %2949 = dma.done.wait (%p2583_p6), %s2165_s0, 32  }
 0x3bc   : > { %2951 = vsyncadd (%p2583_p6), %s2165_s0, 4294967264  ;;  %s28_s14 = sadd.s32 1, %s3002_s14   ;;  %s4094_s23 = sld [smem:[#allocation18_spill]] }
 0x3bd   : > { %p3995_p3 = scmp.ge.s32.totalorder %s28_s14, 6   ;;  %s4095_s28 = sld [smem:[#allocation24_spill]] }
 0x3be   : > { %s4096_s21 = sld [smem:[#allocation22_spill]]  ;;  %s4101_s26 = smov %s2958_s27 }
 0x3bf   : > { %s4097_s10 = sld [smem:[#allocation23_spill]]  ;;  %s4103_s29 = smov %s2970_s30 }
 0x3c0   : > { %s4098_s11 = sld [smem:[#allocation19_spill]]  ;;  %s4105_s8 = smov %s2978_s9 }
 0x3c1   : > { %s4099_s6 = sld [smem:[#allocation20_spill]]  ;;  %s4106_s9 = smov %s2982_s5 }
 0x3c2   : > { %s4100_s13 = sld [smem:[#allocation21_spill]]  ;;  %s4102_s27 = smov %s4094_s23 }
 0x3c3   :  { %27 = sbr.rel (!%p3995_p3) target bundleno = 17 (0x11), region = 172 }
 0x3c4   : > { %s4104_s30 = smov %s4096_s21 }
 0x3c5   : > { %s4107_s5 = smov %s4097_s10  ;;  %s4108_s10 = smov %s2994_s12 }
 0x3c7   : > { %s4109_s12 = smov %s4099_s6 }
 0x3c8   :  { %2170 = vsyncpa [#allocation5], 1 }
 0x3c9   :  { %2172 = vsyncpa [#allocation5 + $0x1], 1 }
 0x3ca   :  { %2173 = vsyncpa [#allocation6], 1 }
 0x3cb   :  { %2175 = vsyncpa [#allocation6 + $0x1], 1 }
 0x3cc   :  { %2176 = vsyncpa [#allocation10], 1 }
 0x3cd   :  { %2178 = vsyncpa [#allocation10 + $0x1], 1 }

</bundles_post_ra>
